<compile_context>
chip_gen: v7x
topology: tpu7x:2x2x1
jax: 0.10.0
libtpu: 0.0.40
codegen_flags: <defaults>
</compile_context>

<pallas_src>
import jax
import jax.numpy as jnp
from jax.experimental import pallas as pl
from jax.experimental.pallas import tpu as pltpu

LANE = 128


def behavior_kernel(x_ref,
                    w1_ref, b1_ref,
                    w2_ref, b2_ref,
                    w3_ref, b3_ref,
                    w4_ref, b4_ref,
                    w5_ref, b5_ref,
                    o_ref):
    """Fused 5-layer MLP on one batch tile, entirely VMEM-resident."""

    def layer(h, w_ref, b_ref, relu):
        # Cast to the weight dtype (bf16) only at the MXU input; accumulate in
        # f32; bias-add / ReLU on the f32 VPU path (v5e has no bf16 VALU).
        y = jnp.dot(h.astype(w_ref.dtype), w_ref[...],
                    preferred_element_type=jnp.float32)
        y = y + b_ref[...]
        if relu:
            # Narrow the carried activation to bf16: same number of casts as
            # casting at the next MXU input, half the live inter-layer tile.
            return jnp.maximum(y, 0.0).astype(jnp.bfloat16)
        return y

    h = x_ref[...]
    h = layer(h, w1_ref, b1_ref, True)
    h = layer(h, w2_ref, b2_ref, True)
    h = layer(h, w3_ref, b3_ref, True)
    h = layer(h, w4_ref, b4_ref, True)
    h = layer(h, w5_ref, b5_ref, False)          # f32, lane-dense (128 wide)
    o_ref[...] = h.astype(o_ref.dtype)


def _tensorcores_sharing_grid():
    """How many TensorCores a 'parallel' grid axis is sharded across."""
    try:
        kind = jax.devices()[0].device_kind.lower()
    except Exception:
        return 1
    # v5e / v6e ("lite" chips): 1 TensorCore -- the grid is a serial loop.
    if "lite" in kind or "v5e" in kind or "v6e" in kind:
        return 1
    # v2 / v3 expose each TensorCore as its own JAX device.
    if "v2" in kind or "v3" in kind:
        return 1
    # v7x (and v4/v5p megacore): 2 TensorCores share the parallel grid axis.
    return 2


def _choose_batch_tile(B, batch_tile, n_cores):
    """Sublane-legal batch tile that always divides B."""

    def largest_dividing_tile(cap):
        if B <= cap:
            return B                      # full-batch block is always legal
        for tb in range(min(cap, B), 7, -1):
            if B % tb == 0 and tb % 8 == 0:
                return tb
        return B                          # no aligned divisor: single fat step

    if n_cores <= 1:
        # Single TC: fewest, fattest steps (each grid step costs ~0.35 us).
        return largest_dividing_tile(max(batch_tile, 512))
    # Two TCs: even number of equal, sublane-aligned steps; prefer 256-row
    # tiles (matches the 2x256^2 MXU M dimension) when the batch allows.
    if B % 512 == 0:
        return 256
    if B % 16 == 0:
        return B // 2                     # 2 equal steps, tb % 8 == 0
    return B                              # tiny/ragged batch: single step


def behavior_forward(x, params, *, batch_tile=512):
    """x: (B, input_shape) float32. params: list of (W, b), W (in, out), b (1, out)."""
    B, d_in = x.shape
    d_out = params[-1][0].shape[1]
    d_pad = pl.cdiv(d_out, LANE) * LANE   # lane-dense padded output width

    tb = _choose_batch_tile(B, batch_tile, _tensorcores_sharing_grid())
    assert B % tb == 0, "batch must be divisible by the batch tile"
    grid = (B // tb,)

    # Weights as bf16 (halves HBM traffic, native MXU rate); biases stay f32.
    # Final layer zero-padded to 128 lanes for unmasked full-width stores.
    flat_params = []
    in_specs = [pl.BlockSpec((tb, d_in), lambda i: (i, 0))]
    n_layers = len(params)
    for li, (w, b) in enumerate(params):
        w = w.astype(jnp.bfloat16)
        b = b.astype(jnp.float32)
        if li == n_layers - 1 and d_pad != d_out:
            w = jnp.pad(w, ((0, 0), (0, d_pad - d_out)))
            b = jnp.pad(b, ((0, 0), (0, d_pad - d_out)))
        flat_params += [w, b]
        # Constant index_map -> weights/biases stay VMEM resident across the
        # grid (never re-fetched). Their second pipeline buffer is dead VMEM
        # (~1.6 MiB total), still far under the 32 MiB scoped budget.
        in_specs.append(pl.BlockSpec(w.shape, lambda i: (0, 0)))
        in_specs.append(pl.BlockSpec(b.shape, lambda i: (0, 0)))

    # Advisory cost estimate so XLA overlaps this call with surrounding ops.
    flops = 0
    bytes_accessed = int(x.size) * 4 + B * d_pad * 4
    for w, b in params:
        flops += 2 * B * int(w.shape[0]) * int(w.shape[1])
        bytes_accessed += int(w.size) * 2 + int(b.size) * 4

    out_padded = pl.pallas_call(
        behavior_kernel,
        out_shape=jax.ShapeDtypeStruct((B, d_pad), jnp.float32),
        grid_spec=pltpu.PrefetchScalarGridSpec(
            num_scalar_prefetch=0,
            grid=grid,
            in_specs=in_specs,
            out_specs=pl.BlockSpec((tb, d_pad), lambda i: (i, 0)),
        ),
        compiler_params=pltpu.CompilerParams(
            dimension_semantics=("parallel",),
            # bf16 weights double-buffered (~3.2 MiB) + activation tiles at
            # tb=512 (~2 MiB) + slack; v5e's default scoped limit is 16 MiB.
            vmem_limit_bytes=32 * 1024 * 1024,
        ),
        cost_estimate=pl.CostEstimate(
            flops=flops, transcendentals=0, bytes_accessed=bytes_accessed),
    )(x, *flat_params)

    # TODO(synk): for latency-critical B~8 inference the kernel is pure weight
    # DMA + launch latency; hide it with a cross-pallas_call weight prefetch
    # (start the HBM->VMEM DMA in a prior call, return sem + VMEM ref) or by
    # batching multiple env steps per call -- nothing inside this kernel can
    # recover that latency.
    return out_padded[:, :d_out]


def init_params(key, input_shape, num_actions, hidden=512):
    """Deterministic init mimicking nn.Linear's U(-1/sqrt(fan_in), 1/sqrt(fan_in)).
    Weights stored as (in, out) = transpose of PyTorch's (out, in)."""
    dims = [input_shape, hidden, hidden, hidden, hidden, num_actions]
    params = []
    for i in range(5):
        fan_in, fan_out = dims[i], dims[i + 1]
        key, kw, kb = jax.random.split(key, 3)
        bound = 1.0 / jnp.sqrt(jnp.float32(fan_in))
        w = jax.random.uniform(kw, (fan_in, fan_out), jnp.float32, -bound, bound)
        b = jax.random.uniform(kb, (1, fan_out), jnp.float32, -bound, bound)
        params.append((w, b))
    return params


def behavior_ref(x, params):
    """Pure-JAX f32 reference of the PyTorch forward."""
    h = x
    for i, (w, b) in enumerate(params):
        h = h @ w + b
        if i < len(params) - 1:
            h = jnp.maximum(h, 0.0)
    return h


if __name__ == "__main__":
    key = jax.random.PRNGKey(0)
    input_shape = 32     # observation features (+ desired return / horizon)
    num_actions = 4
    batch = 8

    kx, kp, kx2 = jax.random.split(key, 3)
    params = init_params(kp, input_shape, num_actions)

    # Small inference-style batch (single grid step on every generation).
    x = jax.random.normal(kx, (batch, input_shape), jnp.float32)
    out = jax.block_until_ready(behavior_forward(x, params))
    ref = behavior_ref(x, params)
    assert out.shape == (batch, num_actions)
    # bf16 weights/activations -> loosened tolerance vs the f32 reference.
    assert jnp.allclose(out, ref, atol=5e-2, rtol=5e-2), "mismatch vs reference (small batch)"

    # Larger batch: exercises fat single-step tiling on v5e/v6e and the
    # even 2x256-row parallel grid on v7x.
    x2 = jax.random.normal(kx2, (512, input_shape), jnp.float32)
    out2 = jax.block_until_ready(behavior_forward(x2, params))
    ref2 = behavior_ref(x2, params)
    assert out2.shape == (512, num_actions)
    assert jnp.allclose(out2, ref2, atol=5e-2, rtol=5e-2), "mismatch vs reference (tiled batch)"

    print("KERNEL_OK")
</pallas_src>

<mosaic_0001>
module attributes {stable_mosaic.version = 11 : i64} {
  func.func @behavior_kernel(%arg0: i32, %arg1: memref<8x32xf32, #tpu.memory_space<vmem>>, %arg2: memref<32x512xbf16, #tpu.memory_space<vmem>>, %arg3: memref<1x512xf32, #tpu.memory_space<vmem>>, %arg4: memref<512x512xbf16, #tpu.memory_space<vmem>>, %arg5: memref<1x512xf32, #tpu.memory_space<vmem>>, %arg6: memref<512x512xbf16, #tpu.memory_space<vmem>>, %arg7: memref<1x512xf32, #tpu.memory_space<vmem>>, %arg8: memref<512x512xbf16, #tpu.memory_space<vmem>>, %arg9: memref<1x512xf32, #tpu.memory_space<vmem>>, %arg10: memref<512x128xbf16, #tpu.memory_space<vmem>>, %arg11: memref<1x128xf32, #tpu.memory_space<vmem>>, %arg12: memref<8x128xf32, #tpu.memory_space<vmem>>) attributes {dimension_semantics = [#tpu.dimension_semantics<parallel>], iteration_bounds = array<i64: 1>, scalar_prefetch = 0 : i64, scratch_operands = 0 : i64, tpu.core_type = #tpu.core_type<tc>, window_params = [{transform_indices = @transform_0, window_bounds = array<i64: 8, 32>}, {pipeline_mode = #tpu.pipeline_mode<synchronous>, transform_indices = @transform_1, window_bounds = array<i64: 32, 512>}, {pipeline_mode = #tpu.pipeline_mode<synchronous>, transform_indices = @transform_2, window_bounds = array<i64: 1, 512>}, {pipeline_mode = #tpu.pipeline_mode<synchronous>, transform_indices = @transform_3, window_bounds = array<i64: 512, 512>}, {pipeline_mode = #tpu.pipeline_mode<synchronous>, transform_indices = @transform_4, window_bounds = array<i64: 1, 512>}, {pipeline_mode = #tpu.pipeline_mode<synchronous>, transform_indices = @transform_5, window_bounds = array<i64: 512, 512>}, {pipeline_mode = #tpu.pipeline_mode<synchronous>, transform_indices = @transform_6, window_bounds = array<i64: 1, 512>}, {pipeline_mode = #tpu.pipeline_mode<synchronous>, transform_indices = @transform_7, window_bounds = array<i64: 512, 512>}, {pipeline_mode = #tpu.pipeline_mode<synchronous>, transform_indices = @transform_8, window_bounds = array<i64: 1, 512>}, {pipeline_mode = #tpu.pipeline_mode<synchronous>, transform_indices = @transform_9, window_bounds = array<i64: 512, 128>}, {pipeline_mode = #tpu.pipeline_mode<synchronous>, transform_indices = @transform_10, window_bounds = array<i64: 1, 128>}, {transform_indices = @transform_11, window_bounds = array<i64: 8, 128>}]} {
    %c0 = arith.constant 0 : index
    %c0_0 = arith.constant 0 : index
    %0 = vector.load %arg1[%c0, %c0_0] : memref<8x32xf32, #tpu.memory_space<vmem>>, vector<8x32xf32>
    %1 = arith.truncf %0 : vector<8x32xf32> to vector<8x32xbf16>
    %c0_1 = arith.constant 0 : index
    %c0_2 = arith.constant 0 : index
    %2 = vector.load %arg2[%c0_1, %c0_2] : memref<32x512xbf16, #tpu.memory_space<vmem>>, vector<32x512xbf16>
    %cst = arith.constant dense<0.000000e+00> : vector<8x512xf32>
    %3 = tpu.matmul %1, %2, %cst {dimension_numbers = #tpu.dot_dimension_numbers<[1], [0], [0], [1], [0, 0, 1, 1], [], []>} : vector<8x32xbf16>, vector<32x512xbf16>, vector<8x512xf32> -> vector<8x512xf32>
    %c0_3 = arith.constant 0 : index
    %c0_4 = arith.constant 0 : index
    %4 = vector.load %arg3[%c0_3, %c0_4] : memref<1x512xf32, #tpu.memory_space<vmem>>, vector<1x512xf32>
    %5 = vector.broadcast %4 : vector<1x512xf32> to vector<8x512xf32>
    %6 = arith.addf %3, %5 : vector<8x512xf32>
    %cst_5 = arith.constant 0.000000e+00 : f32
    %7 = vector.broadcast %cst_5 : f32 to vector<8x512xf32>
    %8 = arith.maximumf %6, %7 : vector<8x512xf32>
    %9 = arith.truncf %8 : vector<8x512xf32> to vector<8x512xbf16>
    %c0_6 = arith.constant 0 : index
    %c0_7 = arith.constant 0 : index
    %10 = vector.load %arg4[%c0_6, %c0_7] : memref<512x512xbf16, #tpu.memory_space<vmem>>, vector<512x512xbf16>
    %cst_8 = arith.constant dense<0.000000e+00> : vector<8x512xf32>
    %11 = tpu.matmul %9, %10, %cst_8 {dimension_numbers = #tpu.dot_dimension_numbers<[1], [0], [0], [1], [0, 0, 1, 1], [], []>} : vector<8x512xbf16>, vector<512x512xbf16>, vector<8x512xf32> -> vector<8x512xf32>
    %c0_9 = arith.constant 0 : index
    %c0_10 = arith.constant 0 : index
    %12 = vector.load %arg5[%c0_9, %c0_10] : memref<1x512xf32, #tpu.memory_space<vmem>>, vector<1x512xf32>
    %13 = vector.broadcast %12 : vector<1x512xf32> to vector<8x512xf32>
    %14 = arith.addf %11, %13 : vector<8x512xf32>
    %cst_11 = arith.constant 0.000000e+00 : f32
    %15 = vector.broadcast %cst_11 : f32 to vector<8x512xf32>
    %16 = arith.maximumf %14, %15 : vector<8x512xf32>
    %17 = arith.truncf %16 : vector<8x512xf32> to vector<8x512xbf16>
    %c0_12 = arith.constant 0 : index
    %c0_13 = arith.constant 0 : index
    %18 = vector.load %arg6[%c0_12, %c0_13] : memref<512x512xbf16, #tpu.memory_space<vmem>>, vector<512x512xbf16>
    %cst_14 = arith.constant dense<0.000000e+00> : vector<8x512xf32>
    %19 = tpu.matmul %17, %18, %cst_14 {dimension_numbers = #tpu.dot_dimension_numbers<[1], [0], [0], [1], [0, 0, 1, 1], [], []>} : vector<8x512xbf16>, vector<512x512xbf16>, vector<8x512xf32> -> vector<8x512xf32>
    %c0_15 = arith.constant 0 : index
    %c0_16 = arith.constant 0 : index
    %20 = vector.load %arg7[%c0_15, %c0_16] : memref<1x512xf32, #tpu.memory_space<vmem>>, vector<1x512xf32>
    %21 = vector.broadcast %20 : vector<1x512xf32> to vector<8x512xf32>
    %22 = arith.addf %19, %21 : vector<8x512xf32>
    %cst_17 = arith.constant 0.000000e+00 : f32
    %23 = vector.broadcast %cst_17 : f32 to vector<8x512xf32>
    %24 = arith.maximumf %22, %23 : vector<8x512xf32>
    %25 = arith.truncf %24 : vector<8x512xf32> to vector<8x512xbf16>
    %c0_18 = arith.constant 0 : index
    %c0_19 = arith.constant 0 : index
    %26 = vector.load %arg8[%c0_18, %c0_19] : memref<512x512xbf16, #tpu.memory_space<vmem>>, vector<512x512xbf16>
    %cst_20 = arith.constant dense<0.000000e+00> : vector<8x512xf32>
    %27 = tpu.matmul %25, %26, %cst_20 {dimension_numbers = #tpu.dot_dimension_numbers<[1], [0], [0], [1], [0, 0, 1, 1], [], []>} : vector<8x512xbf16>, vector<512x512xbf16>, vector<8x512xf32> -> vector<8x512xf32>
    %c0_21 = arith.constant 0 : index
    %c0_22 = arith.constant 0 : index
    %28 = vector.load %arg9[%c0_21, %c0_22] : memref<1x512xf32, #tpu.memory_space<vmem>>, vector<1x512xf32>
    %29 = vector.broadcast %28 : vector<1x512xf32> to vector<8x512xf32>
    %30 = arith.addf %27, %29 : vector<8x512xf32>
    %cst_23 = arith.constant 0.000000e+00 : f32
    %31 = vector.broadcast %cst_23 : f32 to vector<8x512xf32>
    %32 = arith.maximumf %30, %31 : vector<8x512xf32>
    %33 = arith.truncf %32 : vector<8x512xf32> to vector<8x512xbf16>
    %c0_24 = arith.constant 0 : index
    %c0_25 = arith.constant 0 : index
    %34 = vector.load %arg10[%c0_24, %c0_25] : memref<512x128xbf16, #tpu.memory_space<vmem>>, vector<512x128xbf16>
    %cst_26 = arith.constant dense<0.000000e+00> : vector<8x128xf32>
    %35 = tpu.matmul %33, %34, %cst_26 {dimension_numbers = #tpu.dot_dimension_numbers<[1], [0], [0], [1], [0, 0, 1, 1], [], []>} : vector<8x512xbf16>, vector<512x128xbf16>, vector<8x128xf32> -> vector<8x128xf32>
    %c0_27 = arith.constant 0 : index
    %c0_28 = arith.constant 0 : index
    %36 = vector.load %arg11[%c0_27, %c0_28] : memref<1x128xf32, #tpu.memory_space<vmem>>, vector<1x128xf32>
    %37 = vector.broadcast %36 : vector<1x128xf32> to vector<8x128xf32>
    %38 = arith.addf %35, %37 : vector<8x128xf32>
    %c0_29 = arith.constant 0 : index
    %c0_30 = arith.constant 0 : index
    %39 = vector.load %arg12[%c0_29, %c0_30] : memref<8x128xf32, #tpu.memory_space<vmem>>, vector<8x128xf32>
    tpu.vector_store %arg12[%c0_29, %c0_30], %38 {strides = array<i32>} : memref<8x128xf32, #tpu.memory_space<vmem>>, vector<8x128xf32>,
    return
  }
  func.func @transform_0(%arg0: i32) -> (i32, i32) {
    %c0_i32 = arith.constant 0 : i32
    %c0_i32_0 = arith.constant 0 : i32
    return %arg0, %c0_i32 : i32, i32
  }
  func.func @transform_1(%arg0: i32) -> (i32, i32) {
    %c0_i32 = arith.constant 0 : i32
    %c0_i32_0 = arith.constant 0 : i32
    %c0_i32_1 = arith.constant 0 : i32
    return %c0_i32, %c0_i32_0 : i32, i32
  }
  func.func @transform_2(%arg0: i32) -> (i32, i32) {
    %c0_i32 = arith.constant 0 : i32
    %c0_i32_0 = arith.constant 0 : i32
    %c0_i32_1 = arith.constant 0 : i32
    return %c0_i32, %c0_i32_0 : i32, i32
  }
  func.func @transform_3(%arg0: i32) -> (i32, i32) {
    %c0_i32 = arith.constant 0 : i32
    %c0_i32_0 = arith.constant 0 : i32
    %c0_i32_1 = arith.constant 0 : i32
    return %c0_i32, %c0_i32_0 : i32, i32
  }
  func.func @transform_4(%arg0: i32) -> (i32, i32) {
    %c0_i32 = arith.constant 0 : i32
    %c0_i32_0 = arith.constant 0 : i32
    %c0_i32_1 = arith.constant 0 : i32
    return %c0_i32, %c0_i32_0 : i32, i32
  }
  func.func @transform_5(%arg0: i32) -> (i32, i32) {
    %c0_i32 = arith.constant 0 : i32
    %c0_i32_0 = arith.constant 0 : i32
    %c0_i32_1 = arith.constant 0 : i32
    return %c0_i32, %c0_i32_0 : i32, i32
  }
  func.func @transform_6(%arg0: i32) -> (i32, i32) {
    %c0_i32 = arith.constant 0 : i32
    %c0_i32_0 = arith.constant 0 : i32
    %c0_i32_1 = arith.constant 0 : i32
    return %c0_i32, %c0_i32_0 : i32, i32
  }
  func.func @transform_7(%arg0: i32) -> (i32, i32) {
    %c0_i32 = arith.constant 0 : i32
    %c0_i32_0 = arith.constant 0 : i32
    %c0_i32_1 = arith.constant 0 : i32
    return %c0_i32, %c0_i32_0 : i32, i32
  }
  func.func @transform_8(%arg0: i32) -> (i32, i32) {
    %c0_i32 = arith.constant 0 : i32
    %c0_i32_0 = arith.constant 0 : i32
    %c0_i32_1 = arith.constant 0 : i32
    return %c0_i32, %c0_i32_0 : i32, i32
  }
  func.func @transform_9(%arg0: i32) -> (i32, i32) {
    %c0_i32 = arith.constant 0 : i32
    %c0_i32_0 = arith.constant 0 : i32
    %c0_i32_1 = arith.constant 0 : i32
    return %c0_i32, %c0_i32_0 : i32, i32
  }
  func.func @transform_10(%arg0: i32) -> (i32, i32) {
    %c0_i32 = arith.constant 0 : i32
    %c0_i32_0 = arith.constant 0 : i32
    %c0_i32_1 = arith.constant 0 : i32
    return %c0_i32, %c0_i32_0 : i32, i32
  }
  func.func @transform_11(%arg0: i32) -> (i32, i32) {
    %c0_i32 = arith.constant 0 : i32
    %c0_i32_0 = arith.constant 0 : i32
    return %arg0, %c0_i32 : i32, i32
  }
}

</mosaic_0001>

<bundles_post_ra>
// kernel: tpu_custom_call.1
= control target key start
LH: loop header
LB: loop body
LE: loop exit
PB: predicated region body
PF: predicated region fallthrough
CT: control target
= control target key end

     0   :  { %16 = vsyncpa [#allocation3], 0  ;;  %s5077_s0 = inlined_call_operand.hbm [shape: f32[8,32], index: 0, kind: input, shape index: {}]   ;;  %s5078_s1 = inlined_call_operand.hbm [shape: bf16[32,512], index: 1, kind: input, shape index: {}]   ;;  %s5079_s2 = inlined_call_operand.vmem [shape: f32[1,512], index: 2, kind: input, shape index: {}]   ;;  %s5080_s3 = inlined_call_operand.hbm [shape: bf16[512,512], index: 3, kind: input, shape index: {}]   ;;  %s5081_s4 = inlined_call_operand.vmem [shape: f32[1,512], index: 4, kind: input, shape index: {}]   ;;  %s5082_s5 = inlined_call_operand.hbm [shape: bf16[512,512], index: 5, kind: input, shape index: {}]   ;;  %s5083_s6 = inlined_call_operand.vmem [shape: f32[1,512], index: 6, kind: input, shape index: {}]   ;;  %s5084_s7 = inlined_call_operand.hbm [shape: bf16[512,512], index: 7, kind: input, shape index: {}]   ;;  %s5085_s8 = inlined_call_operand.vmem [shape: f32[1,512], index: 8, kind: input, shape index: {}]   ;;  %s5086_s9 = inlined_call_operand.hbm [shape: bf16[512,128], index: 9, kind: input, shape index: {}]   ;;  %s5087_s10 = inlined_call_operand.vmem [shape: f32[1,128], index: 10, kind: input, shape index: {}]   ;;  %s5088_s11 = inlined_call_operand.hbm [shape: f32[8,128], index: 11, kind: output, shape index: {}]  }
   0x1   :  { %17 = vsyncpa [#allocation6], 0 }
   0x2   :  { %18 = vsyncpa [#allocation9], 0 }
   0x3   :  { %19 = vsyncpa [#allocation12], 0 }
   0x4   :  { %20 = vsyncpa [#allocation4], 0  ;;  %s4837_s17 = smov [#allocation5]   ;;  %s4673_s21 = scalar_lea.hbm %s5078_s1, 1024 }
   0x5   :  { %s36_s18 = sshll.u32 %s4837_s17, 4  ;;  %p4674_p0 = scmp.ne.s32.totalorder %s5078_s1, %s4673_s21  ;;  %s37_s18 = int_to_ptr.vmem [resolvable:$true] %s36_s18 }
   0x6   :  { %p4677_p1 = scmp.lt.u32.totalorder %s4673_s21, %s5078_s1 }
   0x8   :  { %p4679_p2 = pnand %p4677_p1, %p4674_p0 }
   0xa   :  { %4682 = shalt.err (!%p4679_p2)
}
   0xb   :  { %s4683_s26 = scalar_lea.vmem %s37_s18, 1024  ;;  %p4688_p4 = scmp.lt.s32.totalorder %s37_s18, %s37_s18 }
   0xc   :  { %p4684_p3 = scmp.ne.s32.totalorder %s37_s18, %s4683_s26  ;;  %p4689_p5 = scmp.lt.s32.totalorder %s4683_s26, %s4683_s26 }
   0xe   :  { %p4690_p6 = por %p4689_p5, %p4688_p4 }
  0x10   :  { %p4691_p7 = pnand %p4690_p6, %p4684_p3 }
  0x12   :  { %4694 = shalt.err (!%p4691_p7)
}
  0x13   :  { %s4838_s27 = smov 256   ;;  %s4839_s28 = smov 16  }
  0x14   :  { %42 = dma.hbm_to_vmem [thread:$0]  %s5078_s1, 1024, %s37_s18, [#allocation6], %s4838_s27, %s4838_s27, %s4839_s28  }
  0x15   :  { %s4840_s12 = smov [#allocation8]   ;;  %s4841_s14 = smov [#allocation2]  }
  0x16   :  { %s64_s13 = sshll.u32 %s4840_s12, 4  ;;  %s27_s15 = sshll.u32 %s4841_s14, 4  ;;  %s65_s13 = int_to_ptr.vmem [resolvable:$true] %s64_s13  ;;  %s28_s15 = int_to_ptr.vmem [resolvable:$true] %s27_s15 }
  0x17   :  { %s4695_s19 = scalar_lea.hbm %s5082_s5, 16384 }
  0x18   :  { %p4696_p8 = scmp.ne.s32.totalorder %s5082_s5, %s4695_s19  ;;  %p4699_p9 = scmp.lt.u32.totalorder %s4695_s19, %s5082_s5 }
  0x1a   :  { %p4701_p10 = pnand %p4699_p9, %p4696_p8 }
  0x1c   :  { %4704 = shalt.err (!%p4701_p10)
}
  0x1d   :  { %s4705_s1 = scalar_lea.vmem %s65_s13, 16384  ;;  %p4710_p12 = scmp.lt.s32.totalorder %s65_s13, %s65_s13 }
  0x1e   :  { %p4706_p11 = scmp.ne.s32.totalorder %s65_s13, %s4705_s1  ;;  %p4711_p13 = scmp.lt.s32.totalorder %s4705_s1, %s4705_s1 }
  0x20   :  { %p4712_p0 = por %p4711_p13, %p4710_p12 }
  0x22   :  { %p4713_p1 = pnand %p4712_p0, %p4706_p11 }
  0x24   :  { %4716 = shalt.err (!%p4713_p1)
}
  0x25   :  { %70 = dma.hbm_to_vmem [thread:$0]  %s5082_s5, 16384, %s65_s13, [#allocation9], %s4838_s27, %s4838_s27, %s4839_s28  }
  0x26   :  { %s4717_s29 = scalar_lea.hbm %s5077_s0, 128 }
  0x27   :  { %p4718_p2 = scmp.ne.s32.totalorder %s5077_s0, %s4717_s29  ;;  %p4721_p3 = scmp.lt.u32.totalorder %s4717_s29, %s5077_s0 }
  0x29   :  { %p4723_p4 = pnand %p4721_p3, %p4718_p2 }
  0x2b   :  { %4726 = shalt.err (!%p4723_p4)
}
  0x2c   :  { %s4727_s17 = scalar_lea.vmem %s28_s15, 128  ;;  %p4732_p6 = scmp.lt.s32.totalorder %s28_s15, %s28_s15 }
  0x2d   :  { %p4728_p5 = scmp.ne.s32.totalorder %s28_s15, %s4727_s17  ;;  %p4733_p7 = scmp.lt.s32.totalorder %s4727_s17, %s4727_s17 }
  0x2f   :  { %p4734_p8 = por %p4733_p7, %p4732_p6 }
  0x31   :  { %p4735_p9 = pnand %p4734_p8, %p4728_p5 }
  0x33   :  { %4738 = shalt.err (!%p4735_p9)
}
  0x34   :  { %30 = dma.hbm_to_vmem [thread:$0]  %s5077_s0, 128, %s28_s15, [#allocation3]  }
  0x35   :  { %s4842_s19 = smov [#allocation7]   ;;  %s4843_s21 = smov [#allocation10]  }
  0x36   :  { %s50_s20 = sshll.u32 %s4842_s19, 4  ;;  %s78_s22 = sshll.u32 %s4843_s21, 4  ;;  %s51_s20 = int_to_ptr.vmem [resolvable:$true] %s50_s20  ;;  %s79_s22 = int_to_ptr.vmem [resolvable:$true] %s78_s22 }
  0x37   :  { %s4739_s18 = scalar_lea.hbm %s5080_s3, 16384 }
  0x38   :  { %p4740_p10 = scmp.ne.s32.totalorder %s5080_s3, %s4739_s18  ;;  %p4743_p11 = scmp.lt.u32.totalorder %s4739_s18, %s5080_s3 }
  0x3a   :  { %p4745_p12 = pnand %p4743_p11, %p4740_p10 }
  0x3c   :  { %4748 = shalt.err (!%p4745_p12)
}
  0x3d   :  { %s4749_s0 = scalar_lea.vmem %s51_s20, 16384  ;;  %p4754_p0 = scmp.lt.s32.totalorder %s51_s20, %s51_s20 }
  0x3e   :  { %p4750_p13 = scmp.ne.s32.totalorder %s51_s20, %s4749_s0  ;;  %p4755_p1 = scmp.lt.s32.totalorder %s4749_s0, %s4749_s0 }
  0x40   :  { %p4756_p2 = por %p4755_p1, %p4754_p0 }
  0x42   :  { %p4757_p3 = pnand %p4756_p2, %p4750_p13 }
  0x44   :  { %4760 = shalt.err (!%p4757_p3)
}
  0x45   :  { %56 = dma.hbm_to_vmem [thread:$0]  %s5080_s3, 16384, %s51_s20, [#allocation6], %s4838_s27, %s4838_s27, %s4839_s28  }
  0x46   :  { %s4761_s16 = scalar_lea.hbm %s5084_s7, 16384 }
  0x47   :  { %p4762_p4 = scmp.ne.s32.totalorder %s5084_s7, %s4761_s16  ;;  %p4765_p5 = scmp.lt.u32.totalorder %s4761_s16, %s5084_s7 }
  0x49   :  { %p4767_p6 = pnand %p4765_p5, %p4762_p4 }
  0x4b   :  { %4770 = shalt.err (!%p4767_p6)
}
  0x4c   :  { %s4771_s21 = scalar_lea.vmem %s79_s22, 16384  ;;  %p4776_p8 = scmp.lt.s32.totalorder %s79_s22, %s79_s22 }
  0x4d   :  { %p4772_p7 = scmp.ne.s32.totalorder %s79_s22, %s4771_s21  ;;  %p4777_p9 = scmp.lt.s32.totalorder %s4771_s21, %s4771_s21 }
  0x4f   :  { %p4778_p10 = por %p4777_p9, %p4776_p8 }
  0x51   :  { %p4779_p11 = pnand %p4778_p10, %p4772_p7 }
  0x53   :  { %4782 = shalt.err (!%p4779_p11)
}
  0x54   :  { %84 = dma.hbm_to_vmem [thread:$0]  %s5084_s7, 16384, %s79_s22, [#allocation9], %s4838_s27, %s4838_s27, %s4839_s28  }
  0x55   :  { %s4844_s23 = smov [#allocation11]   ;;  %s4783_s25 = scalar_lea.hbm %s5086_s9, 4096 }
  0x56   :  { %s92_s1 = sshll.u32 %s4844_s23, 4  ;;  %p4784_p12 = scmp.ne.s32.totalorder %s5086_s9, %s4783_s25  ;;  %s93_s1 = int_to_ptr.vmem [resolvable:$true] %s92_s1 }
  0x57   :  { %p4787_p13 = scmp.lt.u32.totalorder %s4783_s25, %s5086_s9 }
  0x59   :  { %p4789_p0 = pnand %p4787_p13, %p4784_p12 }
  0x5b   :  { %4792 = shalt.err (!%p4789_p0)
}
  0x5c   :  { %s4793_s30 = scalar_lea.vmem %s93_s1, 4096  ;;  %p4798_p2 = scmp.lt.s32.totalorder %s93_s1, %s93_s1 }
  0x5d   :  { %p4794_p1 = scmp.ne.s32.totalorder %s93_s1, %s4793_s30  ;;  %p4799_p3 = scmp.lt.s32.totalorder %s4793_s30, %s4793_s30 }
  0x5f   :  { %p4800_p4 = por %p4799_p3, %p4798_p2 }
  0x61   :  { %p4801_p5 = pnand %p4800_p4, %p4794_p1 }
  0x63   :  { %4804 = shalt.err (!%p4801_p5)
}
  0x64   :  { %s4845_s7 = smov 64   ;;  %s4846_s27 = smov 4  }
  0x65   :  { %98 = dma.hbm_to_vmem [thread:$0]  %s5086_s9, 4096, %s93_s1, [#allocation12], %s4845_s7, %s4845_s7, %s4846_s27  }
  0x66   :  { %4827 = dma.done.wait [#allocation3], 128  }
  0x67   :  { %4828 = vsyncadd [#allocation3], 4294967168 }
  0x68   :  { %4829 = dma.done.wait [#allocation6], 17408  }
  0x69   :  { %4830 = vsyncadd [#allocation6], 4294949888 }
  0x6a   :  { %4831 = dma.done.wait [#allocation9], 32768  }
  0x6b   :  { %4832 = vsyncadd [#allocation9], 4294934528 }
  0x6c   :  { %4833 = dma.done.wait [#allocation12], 4096  }
  0x6d   :  { %4834 = vsyncadd [#allocation12], 4294963200  ;;  %v4847_v0 = vmov 0   ;;  %v4053_v1 = vld [vmem:[#allocation5 + $0x4] ss:$16 sps:$4 sm:$0xff]   ;;  %v120_v5 = vld [vmem:[#allocation2] sm:$0xff] }
  0x6e   :  { %228 = vmatprep.mubr.bf16.mxu0 %v4847_v0  ;;  %269 = vmatprep.mubr.bf16.mxu1 %v4847_v0  ;;  %v4055_v2 = vld [vmem:[#allocation5] ss:$16 sps:$4 sm:$0xff]   ;;  %v4056_v3 = vld [vmem:[#allocation5 + $0x24] ss:$16 sps:$4 sm:$0xff]   ;;  %v4059_v6 = vld [vmem:[#allocation5 + $0xc] ss:$16 sps:$4 sm:$0xff]   ;;  %v121_v9 = vpack.c.bf16 %v120_v5, %v120_v5 }
  0x6f   :  { %196 = vmatprep.subr.bf16.mxu0 %v4053_v1  ;;  %v4058_v4 = vld [vmem:[#allocation5 + $0x20] ss:$16 sps:$4 sm:$0xff]   ;;  %v4061_v7 = vld [vmem:[#allocation5 + $0x8] ss:$16 sps:$4 sm:$0xff]   ;;  %237 = vmatprep.subr.bf16.mxu1 %v4059_v6  ;;  %v4062_v8 = vld [vmem:[#allocation5 + $0x2c] ss:$16 sps:$4 sm:$0xff]  }
  0x70   :  { %197 = vmatpush1.bf16.msra.mxu0 %v4055_v2  ;;  %238 = vmatpush1.bf16.msra.mxu1 %v4061_v7  ;;  %v4064_v10 = vld [vmem:[#allocation5 + $0x28] ss:$16 sps:$4 sm:$0xff]   ;;  %v4067_v11 = vld [vmem:[#allocation7 + $0x4] ss:$16 sps:$4 sm:$0xff]   ;;  %vm192_vm0 = vcmask 261120   ;;  %s4848_s13 = smov [#allocation13]  }
  0x71   :  { %198 = vmatprep.subr.bf16.mxu0 %v4056_v3  ;;  %239 = vmatprep.subr.bf16.mxu1 %v4062_v8  ;;  %v4065_v12 = vld [vmem:[#allocation7] ss:$16 sps:$4 sm:$0xff]   ;;  %v4070_v13 = vld [vmem:[#allocation7 + $0xc] ss:$16 sps:$4 sm:$0xff]   ;;  %v4073_v14 = vld [vmem:[#allocation7 + $0x24] ss:$16 sps:$4 sm:$0xff]  }
  0x72   :  { %v4068_v15 = vld [vmem:[#allocation7 + $0x8] ss:$16 sps:$4 sm:$0xff]   ;;  %v4071_v16 = vld [vmem:[#allocation7 + $0x20] ss:$16 sps:$4 sm:$0xff]   ;;  %v4076_v17 = vld [vmem:[#allocation7 + $0x2c] ss:$16 sps:$4 sm:$0xff]  }
  0x73   :  { %v4079_v18 = vld [vmem:[#allocation7 + $0x44] ss:$16 sps:$4 sm:$0xff]   ;;  %v4074_v19 = vld [vmem:[#allocation7 + $0x28] ss:$16 sps:$4 sm:$0xff]   ;;  %v4077_v20 = vld [vmem:[#allocation7 + $0x40] ss:$16 sps:$4 sm:$0xff]  }
  0x74   :  { %199 = vmatpush1.bf16.msra.mxu0 %v4058_v4  ;;  %240 = vmatpush1.bf16.msra.mxu1 %v4064_v10  ;;  %v4082_v21 = vld [vmem:[#allocation7 + $0x4c] ss:$16 sps:$4 sm:$0xff]   ;;  %v4085_v22 = vld [vmem:[#allocation7 + $0x64] ss:$16 sps:$4 sm:$0xff]   ;;  %v4080_v23 = vld [vmem:[#allocation7 + $0x48] ss:$16 sps:$4 sm:$0xff]  }
  0x75   :  { %1076 = vmatprep.subr.bf16.mxu0 %v4067_v11  ;;  %1158 = vmatprep.subr.bf16.mxu1 %v4070_v13  ;;  %v4083_v24 = vld [vmem:[#allocation7 + $0x60] ss:$16 sps:$4 sm:$0xff]   ;;  %v4088_v25 = vld [vmem:[#allocation7 + $0x6c] ss:$16 sps:$4 sm:$0xff]   ;;  %v4091_v26 = vld [vmem:[#allocation7 + $0x84] ss:$16 sps:$4 sm:$0xff]   ;;  %v132_v13 = vlaneseq }
  0x76   :  { %v4086_v27 = vld [vmem:[#allocation7 + $0x68] ss:$16 sps:$4 sm:$0xff]   ;;  %v4089_v28 = vld [vmem:[#allocation7 + $0x80] ss:$16 sps:$4 sm:$0xff]   ;;  %v4094_v29 = vld [vmem:[#allocation7 + $0x8c] ss:$16 sps:$4 sm:$0xff]  }
  0x77   :  { %3542 = vmatmul.mubr.msk.bf16.vlgmr.msra.gmra.mrb[0].mxu0 %vm192_vm0, %v121_v9  ;;  %3543 = vmatmul.mubr.msk.bf16.vlgmr.msra.gmra.mrb[0].mxu1 %vm192_vm0, %v121_v9  ;;  %v4097_v30 = vld [vmem:[#allocation7 + $0xa4] ss:$16 sps:$4 sm:$0xff]   ;;  %v4092_v31 = vld [vmem:[#allocation7 + $0x88] ss:$16 sps:$4 sm:$0xff]   ;;  %v4095_v32 = vld [vmem:[#allocation7 + $0xa0] ss:$16 sps:$4 sm:$0xff]  }
  0x78   :  { %1077 = vmatpush1.bf16.msra.mxu0 %v4065_v12  ;;  %1159 = vmatpush1.bf16.msra.mxu1 %v4068_v15  ;;  %v4100_v33 = vld [vmem:[#allocation7 + $0xac] ss:$16 sps:$4 sm:$0xff]   ;;  %v4103_v34 = vld [vmem:[#allocation7 + $0xc4] ss:$16 sps:$4 sm:$0xff]   ;;  %v4098_v35 = vld [vmem:[#allocation7 + $0xa8] ss:$16 sps:$4 sm:$0xff]  }
  0x79   :  { %1078 = vmatprep.subr.bf16.mxu0 %v4073_v14  ;;  %1160 = vmatprep.subr.bf16.mxu1 %v4076_v17  ;;  %v4101_v36 = vld [vmem:[#allocation7 + $0xc0] ss:$16 sps:$4 sm:$0xff]   ;;  %v4106_v37 = vld [vmem:[#allocation7 + $0xcc] ss:$16 sps:$4 sm:$0xff]   ;;  %v4109_v38 = vld [vmem:[#allocation7 + $0xe4] ss:$16 sps:$4 sm:$0xff]  }
  0x7a   :  { %v4104_v39 = vld [vmem:[#allocation7 + $0xc8] ss:$16 sps:$4 sm:$0xff]   ;;  %v4107_v40 = vld [vmem:[#allocation7 + $0xe0] ss:$16 sps:$4 sm:$0xff]   ;;  %v4112_v41 = vld [vmem:[#allocation7 + $0xec] ss:$16 sps:$4 sm:$0xff]  }
  0x7b   :  { %v4115_v42 = vld [vmem:[#allocation7 + $0x104] ss:$16 sps:$4 sm:$0xff]   ;;  %v4110_v43 = vld [vmem:[#allocation7 + $0xe8] ss:$16 sps:$4 sm:$0xff]   ;;  %v4113_v44 = vld [vmem:[#allocation7 + $0x100] ss:$16 sps:$4 sm:$0xff]  }
  0x7c   :  { %1079 = vmatpush1.bf16.msra.mxu0 %v4071_v16  ;;  %1161 = vmatpush1.bf16.msra.mxu1 %v4074_v19  ;;  %v4118_v45 = vld [vmem:[#allocation7 + $0x10c] ss:$16 sps:$4 sm:$0xff]   ;;  %v4121_v46 = vld [vmem:[#allocation7 + $0x124] ss:$16 sps:$4 sm:$0xff]   ;;  %v4116_v47 = vld [vmem:[#allocation7 + $0x108] ss:$16 sps:$4 sm:$0xff]  }
  0x7d   :  { %1080 = vmatprep.subr.bf16.mxu0 %v4079_v18  ;;  %1162 = vmatprep.subr.bf16.mxu1 %v4082_v21  ;;  %v4119_v48 = vld [vmem:[#allocation7 + $0x120] ss:$16 sps:$4 sm:$0xff]   ;;  %v4124_v49 = vld [vmem:[#allocation7 + $0x12c] ss:$16 sps:$4 sm:$0xff]   ;;  %v4127_v50 = vld [vmem:[#allocation7 + $0x144] ss:$16 sps:$4 sm:$0xff]  }
  0x7e   :  { %v4122_v51 = vld [vmem:[#allocation7 + $0x128] ss:$16 sps:$4 sm:$0xff]   ;;  %v4125_v52 = vld [vmem:[#allocation7 + $0x140] ss:$16 sps:$4 sm:$0xff]   ;;  %v4130_v53 = vld [vmem:[#allocation7 + $0x14c] ss:$16 sps:$4 sm:$0xff]  }
  0x7f   :  { %v4133_v54 = vld [vmem:[#allocation7 + $0x164] ss:$16 sps:$4 sm:$0xff]   ;;  %v4128_v55 = vld [vmem:[#allocation7 + $0x148] ss:$16 sps:$4 sm:$0xff]   ;;  %v4131_v56 = vld [vmem:[#allocation7 + $0x160] ss:$16 sps:$4 sm:$0xff]  }
  0x80   :  { %1081 = vmatpush1.bf16.msra.mxu0 %v4077_v20  ;;  %1163 = vmatpush1.bf16.msra.mxu1 %v4080_v23  ;;  %v4136_v57 = vld [vmem:[#allocation7 + $0x16c] ss:$16 sps:$4 sm:$0xff]   ;;  %v4139_v58 = vld [vmem:[#allocation7 + $0x184] ss:$16 sps:$4 sm:$0xff]   ;;  %v4134_v59 = vld [vmem:[#allocation7 + $0x168] ss:$16 sps:$4 sm:$0xff]  }
  0x81   :  { %1082 = vmatprep.subr.bf16.mxu0 %v4085_v22  ;;  %1164 = vmatprep.subr.bf16.mxu1 %v4088_v25  ;;  %v4137_v60 = vld [vmem:[#allocation7 + $0x180] ss:$16 sps:$4 sm:$0xff]   ;;  %v4142_v61 = vld [vmem:[#allocation7 + $0x18c] ss:$16 sps:$4 sm:$0xff]   ;;  %v4145_v62 = vld [vmem:[#allocation7 + $0x1a4] ss:$16 sps:$4 sm:$0xff]  }
  0x82   :  { %v4140_v63 = vld [vmem:[#allocation7 + $0x188] ss:$16 sps:$4 sm:$0xff]   ;;  %v4143_v0 = vld [vmem:[#allocation7 + $0x1a0] ss:$16 sps:$4 sm:$0xff]   ;;  %v4148_v1 = vld [vmem:[#allocation7 + $0x1ac] ss:$16 sps:$4 sm:$0xff]  }
  0x83   :  { %v4146_v2 = vld [vmem:[#allocation7 + $0x1a8] ss:$16 sps:$4 sm:$0xff]   ;;  %v4151_v3 = vld [vmem:[#allocation7 + $0x1c4] ss:$16 sps:$4 sm:$0xff]   ;;  %v4154_v4 = vld [vmem:[#allocation7 + $0x1cc] ss:$16 sps:$4 sm:$0xff]  }
  0x84   :  { %1083 = vmatpush1.bf16.msra.mxu0 %v4083_v24  ;;  %1165 = vmatpush1.bf16.msra.mxu1 %v4086_v27  ;;  %v4149_v5 = vld [vmem:[#allocation7 + $0x1c0] ss:$16 sps:$4 sm:$0xff]   ;;  %v4152_v6 = vld [vmem:[#allocation7 + $0x1c8] ss:$16 sps:$4 sm:$0xff]   ;;  %v4157_v7 = vld [vmem:[#allocation7 + $0x1e4] ss:$16 sps:$4 sm:$0xff]  }
  0x85   :  { %1084 = vmatprep.subr.bf16.mxu0 %v4091_v26  ;;  %1166 = vmatprep.subr.bf16.mxu1 %v4094_v29  ;;  %v4160_v8 = vld [vmem:[#allocation7 + $0x1ec] ss:$16 sps:$4 sm:$0xff]   ;;  %v4155_v9 = vld [vmem:[#allocation7 + $0x1e0] ss:$16 sps:$4 sm:$0xff]   ;;  %v4158_v10 = vld [vmem:[#allocation7 + $0x1e8] ss:$16 sps:$4 sm:$0xff]  }
  0x86   :  { %v4163_v11 = vld [vmem:[#allocation7 + $0x204] ss:$16 sps:$4 sm:$0xff]   ;;  %v4166_v12 = vld [vmem:[#allocation7 + $0x20c] ss:$16 sps:$4 sm:$0xff]   ;;  %v4993_v14 = vshrl.u32 %v132_v13, 7  ;;  %s3522_s19 = sshll.u32 %s4848_s13, 4  ;;  %s3523_s19 = int_to_ptr.vmem [resolvable:$true] %s3522_s19 }
  0x87   :  { %v5001_v16 = vld [vmem:[%s5079_s2] sm:$0xf]  ;;  %v4223_v13 = vld [vmem:[#allocation7 + $0x344] ss:$16 sps:$4 sm:$0xff]   ;;  %s4805_s21 = scalar_lea.vmem %s3523_s19, 128  ;;  %p4810_p7 = scmp.lt.s32.totalorder %s3523_s19, %s3523_s19 }
  0x88   :  { %1085 = vmatpush1.bf16.msra.mxu0 %v4089_v28  ;;  %1167 = vmatpush1.bf16.msra.mxu1 %v4092_v31  ;;  %v4996_v15 = vsub.s32 0, %v4993_v14  ;;  %v5004_v17 = vsub.s32 1, %v4993_v14  ;;  %v5009_v19 = vsub.s32 3, %v4993_v14  ;;  %p4806_p6 = scmp.ne.s32.totalorder %s3523_s19, %s4805_s21  ;;  %p4811_p8 = scmp.lt.s32.totalorder %s4805_s21, %s4805_s21 }
  0x89   :  { %1086 = vmatprep.subr.bf16.mxu0 %v4097_v30  ;;  %1168 = vmatprep.subr.bf16.mxu1 %v4100_v33 }
  0x8a   :  { %v135_v18 = vrot.slane %v5001_v16, %v4996_v15  ;;  %v139_v20 = vrot.slane %v5001_v16, %v5004_v17  ;;  %v147_v24 = vrot.slane %v5001_v16, %v5009_v19  ;;  %p4812_p9 = por %p4811_p8, %p4810_p7 }
  0x8c   :  { %1087 = vmatpush1.bf16.msra.mxu0 %v4095_v32  ;;  %1169 = vmatpush1.bf16.msra.mxu1 %v4098_v35  ;;  %v4161_v35 = vld [vmem:[#allocation7 + $0x200] ss:$16 sps:$4 sm:$0xff]   ;;  %p4813_p10 = pnand %p4812_p9, %p4806_p6 }
  0x8d   :  { %1088 = vmatprep.subr.bf16.mxu0 %v4103_v34  ;;  %1170 = vmatprep.subr.bf16.mxu1 %v4106_v37 }
  0x90   :  { %1089 = vmatpush1.bf16.msra.mxu0 %v4101_v36  ;;  %1171 = vmatpush1.bf16.msra.mxu1 %v4104_v39  ;;  %v4164_v36 = vld [vmem:[#allocation7 + $0x208] ss:$16 sps:$4 sm:$0xff]   ;;  %v4169_v39 = vld [vmem:[#allocation7 + $0x224] ss:$16 sps:$4 sm:$0xff]  }
  0x91   :  { %1090 = vmatprep.subr.bf16.mxu0 %v4109_v38  ;;  %1172 = vmatprep.subr.bf16.mxu1 %v4112_v41 }
  0x94   :  { %1091 = vmatpush1.bf16.msra.mxu0 %v4107_v40  ;;  %1173 = vmatpush1.bf16.msra.mxu1 %v4110_v43  ;;  %v4172_v40 = vld [vmem:[#allocation7 + $0x22c] ss:$16 sps:$4 sm:$0xff]   ;;  %v4167_v43 = vld [vmem:[#allocation7 + $0x220] ss:$16 sps:$4 sm:$0xff]  }
  0x95   :  { %1092 = vmatprep.subr.bf16.mxu0 %v4115_v42  ;;  %1174 = vmatprep.subr.bf16.mxu1 %v4118_v45  ;;  %v4175_v45 = vld [vmem:[#allocation7 + $0x244] ss:$16 sps:$4 sm:$0xff]  }
  0x98   :  { %1093 = vmatpush1.bf16.msra.mxu0 %v4113_v44  ;;  %1175 = vmatpush1.bf16.msra.mxu1 %v4116_v47  ;;  %v4170_v44 = vld [vmem:[#allocation7 + $0x228] ss:$16 sps:$4 sm:$0xff]   ;;  %v4173_v47 = vld [vmem:[#allocation7 + $0x240] ss:$16 sps:$4 sm:$0xff]  }
  0x99   :  { %1094 = vmatprep.subr.bf16.mxu0 %v4121_v46  ;;  %1176 = vmatprep.subr.bf16.mxu1 %v4124_v49  ;;  %v4178_v46 = vld [vmem:[#allocation7 + $0x24c] ss:$16 sps:$4 sm:$0xff]   ;;  %v4181_v49 = vld [vmem:[#allocation7 + $0x264] ss:$16 sps:$4 sm:$0xff]  }
  0x9c   :  { %1095 = vmatpush1.bf16.msra.mxu0 %v4119_v48  ;;  %1177 = vmatpush1.bf16.msra.mxu1 %v4122_v51  ;;  %v4176_v48 = vld [vmem:[#allocation7 + $0x248] ss:$16 sps:$4 sm:$0xff]   ;;  %v4179_v51 = vld [vmem:[#allocation7 + $0x260] ss:$16 sps:$4 sm:$0xff]  }
  0x9d   :  { %1096 = vmatprep.subr.bf16.mxu0 %v4127_v50  ;;  %1178 = vmatprep.subr.bf16.mxu1 %v4130_v53  ;;  %v4184_v50 = vld [vmem:[#allocation7 + $0x26c] ss:$16 sps:$4 sm:$0xff]   ;;  %v4187_v53 = vld [vmem:[#allocation7 + $0x284] ss:$16 sps:$4 sm:$0xff]  }
  0xa0   :  { %1097 = vmatpush1.bf16.msra.mxu0 %v4125_v52  ;;  %1179 = vmatpush1.bf16.msra.mxu1 %v4128_v55  ;;  %v4182_v52 = vld [vmem:[#allocation7 + $0x268] ss:$16 sps:$4 sm:$0xff]   ;;  %v4185_v55 = vld [vmem:[#allocation7 + $0x280] ss:$16 sps:$4 sm:$0xff]  }
  0xa1   :  { %1098 = vmatprep.subr.bf16.mxu0 %v4133_v54  ;;  %1180 = vmatprep.subr.bf16.mxu1 %v4136_v57  ;;  %v4190_v54 = vld [vmem:[#allocation7 + $0x28c] ss:$16 sps:$4 sm:$0xff]   ;;  %v4193_v57 = vld [vmem:[#allocation7 + $0x2a4] ss:$16 sps:$4 sm:$0xff]  }
  0xa4   :  { %1099 = vmatpush1.bf16.msra.mxu0 %v4131_v56  ;;  %1181 = vmatpush1.bf16.msra.mxu1 %v4134_v59  ;;  %v4188_v56 = vld [vmem:[#allocation7 + $0x288] ss:$16 sps:$4 sm:$0xff]   ;;  %v4191_v59 = vld [vmem:[#allocation7 + $0x2a0] ss:$16 sps:$4 sm:$0xff]  }
  0xa5   :  { %1100 = vmatprep.subr.bf16.mxu0 %v4139_v58  ;;  %1182 = vmatprep.subr.bf16.mxu1 %v4142_v61  ;;  %v4196_v58 = vld [vmem:[#allocation7 + $0x2ac] ss:$16 sps:$4 sm:$0xff]   ;;  %v4199_v61 = vld [vmem:[#allocation7 + $0x2c4] ss:$16 sps:$4 sm:$0xff]  }
  0xa8   :  { %1101 = vmatpush1.bf16.msra.mxu0 %v4137_v60  ;;  %1183 = vmatpush1.bf16.msra.mxu1 %v4140_v63  ;;  %v4194_v60 = vld [vmem:[#allocation7 + $0x2a8] ss:$16 sps:$4 sm:$0xff]   ;;  %v4197_v63 = vld [vmem:[#allocation7 + $0x2c0] ss:$16 sps:$4 sm:$0xff]  }
  0xa9   :  { %1102 = vmatprep.subr.bf16.mxu0 %v4145_v62  ;;  %1184 = vmatprep.subr.bf16.mxu1 %v4148_v1  ;;  %v4202_v62 = vld [vmem:[#allocation7 + $0x2cc] ss:$16 sps:$4 sm:$0xff]   ;;  %v4205_v1 = vld [vmem:[#allocation7 + $0x2e4] ss:$16 sps:$4 sm:$0xff]  }
  0xac   :  { %1103 = vmatpush1.bf16.msra.mxu0 %v4143_v0  ;;  %1185 = vmatpush1.bf16.msra.mxu1 %v4146_v2  ;;  %v4200_v0 = vld [vmem:[#allocation7 + $0x2c8] ss:$16 sps:$4 sm:$0xff]   ;;  %v4208_v2 = vld [vmem:[#allocation7 + $0x2ec] ss:$16 sps:$4 sm:$0xff]  }
  0xad   :  { %1104 = vmatprep.subr.bf16.mxu0 %v4151_v3  ;;  %1186 = vmatprep.subr.bf16.mxu1 %v4154_v4  ;;  %v4203_v3 = vld [vmem:[#allocation7 + $0x2e0] ss:$16 sps:$4 sm:$0xff]   ;;  %v4206_v4 = vld [vmem:[#allocation7 + $0x2e8] ss:$16 sps:$4 sm:$0xff]  }
  0xb0   :  { %1105 = vmatpush1.bf16.msra.mxu0 %v4149_v5  ;;  %1187 = vmatpush1.bf16.msra.mxu1 %v4152_v6  ;;  %v4211_v5 = vld [vmem:[#allocation7 + $0x304] ss:$16 sps:$4 sm:$0xff]   ;;  %v4214_v6 = vld [vmem:[#allocation7 + $0x30c] ss:$16 sps:$4 sm:$0xff]  }
  0xb1   :  { %1106 = vmatprep.subr.bf16.mxu0 %v4157_v7  ;;  %1188 = vmatprep.subr.bf16.mxu1 %v4160_v8  ;;  %v4209_v7 = vld [vmem:[#allocation7 + $0x300] ss:$16 sps:$4 sm:$0xff]   ;;  %v4212_v8 = vld [vmem:[#allocation7 + $0x308] ss:$16 sps:$4 sm:$0xff]  }
  0xb4   :  { %1107 = vmatpush1.bf16.msra.mxu0 %v4155_v9  ;;  %1189 = vmatpush1.bf16.msra.mxu1 %v4158_v10  ;;  %v4217_v9 = vld [vmem:[#allocation7 + $0x324] ss:$16 sps:$4 sm:$0xff]   ;;  %v4220_v10 = vld [vmem:[#allocation7 + $0x32c] ss:$16 sps:$4 sm:$0xff]  }
  0xb5   :  { %1117 = vmatprep.subr.bf16.mxu0 %v4163_v11  ;;  %1199 = vmatprep.subr.bf16.mxu1 %v4166_v12  ;;  %v4215_v11 = vld [vmem:[#allocation7 + $0x320] ss:$16 sps:$4 sm:$0xff]   ;;  %v4218_v12 = vld [vmem:[#allocation7 + $0x328] ss:$16 sps:$4 sm:$0xff]  }
 0x14a   :  { %v230_v21 = vpop.f32.mrb[0].mxu0  ;;  %v5015_v29 = vpop.f32.mrb[0].mxu1 }
 0x14b   :  { %v231_v22 = vadd.f32 %v230_v21, %v135_v18  ;;  %v232_v23 = vpop.f32.mrb[1].mxu0  ;;  %v273_v31 = vpop.f32.mrb[1].mxu1  ;;  %v4226_v18 = vld [vmem:[#allocation7 + $0x34c] ss:$16 sps:$4 sm:$0xff]   ;;  %v4224_v21 = vld [vmem:[#allocation7 + $0x348] ss:$16 sps:$4 sm:$0xff]  }
 0x14c   :  { %v233_v25 = vadd.f32 %v232_v23, %v139_v20  ;;  %v234_v26 = vpop.f32.mrb[2].mxu0  ;;  %v274_v32 = vadd.f32 %v273_v31, %v147_v24  ;;  %v275_v33 = vpop.f32.mrb[2].mxu1  ;;  %v4221_v20 = vld [vmem:[#allocation7 + $0x340] ss:$16 sps:$4 sm:$0xff]   ;;  %v4232_v23 = vld [vmem:[#allocation7 + $0x36c] ss:$16 sps:$4 sm:$0xff]  }
 0x14d   :  { %v278_v27 = vmax.f32 %v231_v22, 0.0  ;;  %v235_v28 = vpop.f32.mrb[3].mxu0  ;;  %v276_v37 = vpop.f32.mrb[3].mxu1  ;;  %v4229_v22 = vld [vmem:[#allocation7 + $0x364] ss:$16 sps:$4 sm:$0xff]   ;;  %v5018_v31 = vsub.s32 2, %v4993_v14 }
 0x14e   :  { %v279_v30 = vmax.f32 %v233_v25, 0.0  ;;  %v281_v41 = vmax.f32 %v274_v32, 0.0  ;;  %v4227_v24 = vld [vmem:[#allocation7 + $0x360] ss:$16 sps:$4 sm:$0xff]   ;;  %v4230_v25 = vld [vmem:[#allocation7 + $0x368] ss:$16 sps:$4 sm:$0xff]  }
 0x14f   :  { %v282_v38 = vpack.c.bf16 %v278_v27, %v278_v27  ;;  %v4235_v26 = vld [vmem:[#allocation7 + $0x384] ss:$16 sps:$4 sm:$0xff]   ;;  %v4238_v27 = vld [vmem:[#allocation7 + $0x38c] ss:$16 sps:$4 sm:$0xff]   ;;  %v4233_v28 = vld [vmem:[#allocation7 + $0x380] ss:$16 sps:$4 sm:$0xff]  }
 0x150   :  { %v283_v34 = vpack.c.bf16 %v279_v30, %v279_v30  ;;  %v285_v42 = vpack.c.bf16 %v281_v41, %v281_v41  ;;  %v4236_v30 = vld [vmem:[#allocation7 + $0x388] ss:$16 sps:$4 sm:$0xff]   ;;  %v4241_v32 = vld [vmem:[#allocation7 + $0x3a4] ss:$16 sps:$4 sm:$0xff]   ;;  %v4244_v33 = vld [vmem:[#allocation7 + $0x3ac] ss:$16 sps:$4 sm:$0xff]  }
 0x151   :  { %v4247_v37 = vld [vmem:[#allocation7 + $0x3c4] ss:$16 sps:$4 sm:$0xff]  }
 0x152   :  { %1108 = vmatprep.mubr.bf16.mxu0 %v283_v34  ;;  %1190 = vmatprep.mubr.bf16.mxu1 %v283_v34  ;;  %v4239_v34 = vld [vmem:[#allocation7 + $0x3a0] ss:$16 sps:$4 sm:$0xff]   ;;  %v4253_v41 = vld [vmem:[#allocation7 + $0x3e4] ss:$16 sps:$4 sm:$0xff]  }
 0x153   :  { %1109 = vmatmul.mubr.bf16.vlgmr.msra.gmra.mrb[4].mxu0 %v282_v38  ;;  %1191 = vmatmul.mubr.bf16.vlgmr.msra.gmra.mrb[4].mxu1 %v282_v38  ;;  %v4250_v38 = vld [vmem:[#allocation7 + $0x3cc] ss:$16 sps:$4 sm:$0xff]  }
 0x154   :  { %1118 = vmatpush1.bf16.msra.mxu0 %v4161_v35  ;;  %1200 = vmatpush1.bf16.msra.mxu1 %v4164_v36  ;;  %v4242_v35 = vld [vmem:[#allocation7 + $0x3a8] ss:$16 sps:$4 sm:$0xff]   ;;  %v143_v36 = vrot.slane %v5001_v16, %v5018_v31  ;;  %v4259_v16 = vld [vmem:[#allocation8 + $0x4] ss:$16 sps:$4 sm:$0xff]  }
 0x155   :  { %1119 = vmatprep.subr.bf16.mxu0 %v4169_v39  ;;  %1201 = vmatprep.subr.bf16.mxu1 %v4172_v40  ;;  %v4245_v39 = vld [vmem:[#allocation7 + $0x3c0] ss:$16 sps:$4 sm:$0xff]   ;;  %v4248_v40 = vld [vmem:[#allocation7 + $0x3c8] ss:$16 sps:$4 sm:$0xff]  }
 0x156   :  { %1149 = vmatprep.mubr.bf16.mxu0 %v285_v42  ;;  %1231 = vmatprep.mubr.bf16.mxu1 %v285_v42  ;;  %v272_v14 = vadd.f32 %v5015_v29, %v143_v36  ;;  %v4256_v42 = vld [vmem:[#allocation7 + $0x3ec] ss:$16 sps:$4 sm:$0xff]   ;;  %v4265_v29 = vld [vmem:[#allocation8 + $0x24] ss:$16 sps:$4 sm:$0xff]  }
 0x157   :  { %v4331_v36 = vld [vmem:[#allocation8 + $0x184] ss:$16 sps:$4 sm:$0xff]  }
 0x158   :  { %1120 = vmatpush1.bf16.msra.mxu0 %v4167_v43  ;;  %1202 = vmatpush1.bf16.msra.mxu1 %v4170_v44  ;;  %v4251_v43 = vld [vmem:[#allocation7 + $0x3e0] ss:$16 sps:$4 sm:$0xff]   ;;  %v4254_v44 = vld [vmem:[#allocation7 + $0x3e8] ss:$16 sps:$4 sm:$0xff]  }
 0x159   :  { %1121 = vmatprep.subr.bf16.mxu0 %v4175_v45  ;;  %1203 = vmatprep.subr.bf16.mxu1 %v4178_v46  ;;  %v280_v45 = vmax.f32 %v272_v14, 0.0  ;;  %v4262_v46 = vld [vmem:[#allocation8 + $0xc] ss:$16 sps:$4 sm:$0xff]  }
 0x15a   :  { %v4340_v14 = vld [vmem:[#allocation8 + $0x1ac] ss:$16 sps:$4 sm:$0xff]  }
 0x15c   :  { %1122 = vmatpush1.bf16.msra.mxu0 %v4173_v47  ;;  %1204 = vmatpush1.bf16.msra.mxu1 %v4176_v48  ;;  %v4257_v47 = vld [vmem:[#allocation8] ss:$16 sps:$4 sm:$0xff]   ;;  %v4260_v48 = vld [vmem:[#allocation8 + $0x8] ss:$16 sps:$4 sm:$0xff]  }
 0x15d   :  { %1123 = vmatprep.subr.bf16.mxu0 %v4181_v49  ;;  %1205 = vmatprep.subr.bf16.mxu1 %v4184_v50  ;;  %v284_v49 = vpack.c.bf16 %v280_v45, %v280_v45  ;;  %v4268_v50 = vld [vmem:[#allocation8 + $0x2c] ss:$16 sps:$4 sm:$0xff]   ;;  %v4341_v45 = vld [vmem:[#allocation8 + $0x1c0] ss:$16 sps:$4 sm:$0xff]  }
 0x160   :  { %1124 = vmatpush1.bf16.msra.mxu0 %v4179_v51  ;;  %1206 = vmatpush1.bf16.msra.mxu1 %v4182_v52  ;;  %v4263_v51 = vld [vmem:[#allocation8 + $0x20] ss:$16 sps:$4 sm:$0xff]   ;;  %v4266_v52 = vld [vmem:[#allocation8 + $0x28] ss:$16 sps:$4 sm:$0xff]  }
 0x161   :  { %1125 = vmatprep.subr.bf16.mxu0 %v4187_v53  ;;  %1207 = vmatprep.subr.bf16.mxu1 %v4190_v54  ;;  %v4271_v53 = vld [vmem:[#allocation8 + $0x44] ss:$16 sps:$4 sm:$0xff]   ;;  %v4274_v54 = vld [vmem:[#allocation8 + $0x4c] ss:$16 sps:$4 sm:$0xff]  }
 0x164   :  { %1126 = vmatpush1.bf16.msra.mxu0 %v4185_v55  ;;  %1208 = vmatpush1.bf16.msra.mxu1 %v4188_v56  ;;  %v4269_v55 = vld [vmem:[#allocation8 + $0x40] ss:$16 sps:$4 sm:$0xff]   ;;  %v4272_v56 = vld [vmem:[#allocation8 + $0x48] ss:$16 sps:$4 sm:$0xff]  }
 0x165   :  { %1127 = vmatprep.subr.bf16.mxu0 %v4193_v57  ;;  %1209 = vmatprep.subr.bf16.mxu1 %v4196_v58  ;;  %v4277_v57 = vld [vmem:[#allocation8 + $0x64] ss:$16 sps:$4 sm:$0xff]   ;;  %v4280_v58 = vld [vmem:[#allocation8 + $0x6c] ss:$16 sps:$4 sm:$0xff]  }
 0x168   :  { %1128 = vmatpush1.bf16.msra.mxu0 %v4191_v59  ;;  %1210 = vmatpush1.bf16.msra.mxu1 %v4194_v60  ;;  %v4275_v59 = vld [vmem:[#allocation8 + $0x60] ss:$16 sps:$4 sm:$0xff]   ;;  %v4278_v60 = vld [vmem:[#allocation8 + $0x68] ss:$16 sps:$4 sm:$0xff]  }
 0x169   :  { %1129 = vmatprep.subr.bf16.mxu0 %v4199_v61  ;;  %1211 = vmatprep.subr.bf16.mxu1 %v4202_v62  ;;  %v4283_v61 = vld [vmem:[#allocation8 + $0x84] ss:$16 sps:$4 sm:$0xff]   ;;  %v4286_v62 = vld [vmem:[#allocation8 + $0x8c] ss:$16 sps:$4 sm:$0xff]  }
 0x16c   :  { %1130 = vmatpush1.bf16.msra.mxu0 %v4197_v63  ;;  %1212 = vmatpush1.bf16.msra.mxu1 %v4200_v0  ;;  %v4281_v63 = vld [vmem:[#allocation8 + $0x80] ss:$16 sps:$4 sm:$0xff]   ;;  %v4284_v0 = vld [vmem:[#allocation8 + $0x88] ss:$16 sps:$4 sm:$0xff]  }
 0x16d   :  { %1131 = vmatprep.subr.bf16.mxu0 %v4205_v1  ;;  %1213 = vmatprep.subr.bf16.mxu1 %v4208_v2  ;;  %v4289_v1 = vld [vmem:[#allocation8 + $0xa4] ss:$16 sps:$4 sm:$0xff]   ;;  %v4292_v2 = vld [vmem:[#allocation8 + $0xac] ss:$16 sps:$4 sm:$0xff]  }
 0x170   :  { %1132 = vmatpush1.bf16.msra.mxu0 %v4203_v3  ;;  %1214 = vmatpush1.bf16.msra.mxu1 %v4206_v4  ;;  %v4287_v3 = vld [vmem:[#allocation8 + $0xa0] ss:$16 sps:$4 sm:$0xff]   ;;  %v4290_v4 = vld [vmem:[#allocation8 + $0xa8] ss:$16 sps:$4 sm:$0xff]  }
 0x171   :  { %1133 = vmatprep.subr.bf16.mxu0 %v4211_v5  ;;  %1215 = vmatprep.subr.bf16.mxu1 %v4214_v6  ;;  %v4295_v5 = vld [vmem:[#allocation8 + $0xc4] ss:$16 sps:$4 sm:$0xff]   ;;  %v4298_v6 = vld [vmem:[#allocation8 + $0xcc] ss:$16 sps:$4 sm:$0xff]  }
 0x174   :  { %1134 = vmatpush1.bf16.msra.mxu0 %v4209_v7  ;;  %1216 = vmatpush1.bf16.msra.mxu1 %v4212_v8  ;;  %v4293_v7 = vld [vmem:[#allocation8 + $0xc0] ss:$16 sps:$4 sm:$0xff]   ;;  %v4296_v8 = vld [vmem:[#allocation8 + $0xc8] ss:$16 sps:$4 sm:$0xff]  }
 0x175   :  { %1135 = vmatprep.subr.bf16.mxu0 %v4217_v9  ;;  %1217 = vmatprep.subr.bf16.mxu1 %v4220_v10  ;;  %v4301_v9 = vld [vmem:[#allocation8 + $0xe4] ss:$16 sps:$4 sm:$0xff]   ;;  %v4304_v10 = vld [vmem:[#allocation8 + $0xec] ss:$16 sps:$4 sm:$0xff]  }
 0x178   :  { %1136 = vmatpush1.bf16.msra.mxu0 %v4215_v11  ;;  %1218 = vmatpush1.bf16.msra.mxu1 %v4218_v12  ;;  %v4299_v11 = vld [vmem:[#allocation8 + $0xe0] ss:$16 sps:$4 sm:$0xff]   ;;  %v4302_v12 = vld [vmem:[#allocation8 + $0xe8] ss:$16 sps:$4 sm:$0xff]  }
 0x179   :  { %1137 = vmatprep.subr.bf16.mxu0 %v4223_v13  ;;  %1219 = vmatprep.subr.bf16.mxu1 %v4226_v18  ;;  %v4307_v13 = vld [vmem:[#allocation8 + $0x104] ss:$16 sps:$4 sm:$0xff]   ;;  %v4310_v18 = vld [vmem:[#allocation8 + $0x10c] ss:$16 sps:$4 sm:$0xff]  }
 0x17c   :  { %1138 = vmatpush1.bf16.msra.mxu0 %v4221_v20  ;;  %1220 = vmatpush1.bf16.msra.mxu1 %v4224_v21  ;;  %v4305_v20 = vld [vmem:[#allocation8 + $0x100] ss:$16 sps:$4 sm:$0xff]   ;;  %v4308_v21 = vld [vmem:[#allocation8 + $0x108] ss:$16 sps:$4 sm:$0xff]  }
 0x17d   :  { %1139 = vmatprep.subr.bf16.mxu0 %v4229_v22  ;;  %1221 = vmatprep.subr.bf16.mxu1 %v4232_v23  ;;  %v4313_v22 = vld [vmem:[#allocation8 + $0x124] ss:$16 sps:$4 sm:$0xff]   ;;  %v4316_v23 = vld [vmem:[#allocation8 + $0x12c] ss:$16 sps:$4 sm:$0xff]  }
 0x180   :  { %1140 = vmatpush1.bf16.msra.mxu0 %v4227_v24  ;;  %1222 = vmatpush1.bf16.msra.mxu1 %v4230_v25  ;;  %v4311_v24 = vld [vmem:[#allocation8 + $0x120] ss:$16 sps:$4 sm:$0xff]   ;;  %v4314_v25 = vld [vmem:[#allocation8 + $0x128] ss:$16 sps:$4 sm:$0xff]  }
 0x181   :  { %1141 = vmatprep.subr.bf16.mxu0 %v4235_v26  ;;  %1223 = vmatprep.subr.bf16.mxu1 %v4238_v27  ;;  %v4319_v26 = vld [vmem:[#allocation8 + $0x144] ss:$16 sps:$4 sm:$0xff]   ;;  %v4322_v27 = vld [vmem:[#allocation8 + $0x14c] ss:$16 sps:$4 sm:$0xff]  }
 0x184   :  { %1142 = vmatpush1.bf16.msra.mxu0 %v4233_v28  ;;  %1224 = vmatpush1.bf16.msra.mxu1 %v4236_v30  ;;  %v4317_v28 = vld [vmem:[#allocation8 + $0x140] ss:$16 sps:$4 sm:$0xff]   ;;  %v4320_v30 = vld [vmem:[#allocation8 + $0x148] ss:$16 sps:$4 sm:$0xff]  }
 0x185   :  { %1143 = vmatprep.subr.bf16.mxu0 %v4241_v32  ;;  %1225 = vmatprep.subr.bf16.mxu1 %v4244_v33  ;;  %v4325_v32 = vld [vmem:[#allocation8 + $0x164] ss:$16 sps:$4 sm:$0xff]   ;;  %v4328_v33 = vld [vmem:[#allocation8 + $0x16c] ss:$16 sps:$4 sm:$0xff]  }
 0x188   :  { %1144 = vmatpush1.bf16.msra.mxu0 %v4239_v34  ;;  %1226 = vmatpush1.bf16.msra.mxu1 %v4242_v35  ;;  %v4323_v34 = vld [vmem:[#allocation8 + $0x160] ss:$16 sps:$4 sm:$0xff]   ;;  %v4326_v35 = vld [vmem:[#allocation8 + $0x168] ss:$16 sps:$4 sm:$0xff]  }
 0x189   :  { %1145 = vmatprep.subr.bf16.mxu0 %v4247_v37  ;;  %1227 = vmatprep.subr.bf16.mxu1 %v4250_v38  ;;  %v4334_v37 = vld [vmem:[#allocation8 + $0x18c] ss:$16 sps:$4 sm:$0xff]   ;;  %v4329_v38 = vld [vmem:[#allocation8 + $0x180] ss:$16 sps:$4 sm:$0xff]  }
 0x18c   :  { %1146 = vmatpush1.bf16.msra.mxu0 %v4245_v39  ;;  %1228 = vmatpush1.bf16.msra.mxu1 %v4248_v40  ;;  %v4332_v39 = vld [vmem:[#allocation8 + $0x188] ss:$16 sps:$4 sm:$0xff]   ;;  %v4337_v40 = vld [vmem:[#allocation8 + $0x1a4] ss:$16 sps:$4 sm:$0xff]  }
 0x18d   :  { %1147 = vmatprep.subr.bf16.mxu0 %v4253_v41  ;;  %1229 = vmatprep.subr.bf16.mxu1 %v4256_v42  ;;  %v4335_v41 = vld [vmem:[#allocation8 + $0x1a0] ss:$16 sps:$4 sm:$0xff]   ;;  %v4338_v42 = vld [vmem:[#allocation8 + $0x1a8] ss:$16 sps:$4 sm:$0xff]  }
 0x190   :  { %1148 = vmatpush1.bf16.msra.mxu0 %v4251_v43  ;;  %1230 = vmatpush1.bf16.msra.mxu1 %v4254_v44  ;;  %v4343_v43 = vld [vmem:[#allocation8 + $0x1c4] ss:$16 sps:$4 sm:$0xff]   ;;  %v4346_v44 = vld [vmem:[#allocation8 + $0x1cc] ss:$16 sps:$4 sm:$0xff]  }
 0x191   :  { %2038 = vmatprep.subr.bf16.mxu0 %v4259_v16  ;;  %2120 = vmatprep.subr.bf16.mxu1 %v4262_v46  ;;  %v4344_v16 = vld [vmem:[#allocation8 + $0x1c8] ss:$16 sps:$4 sm:$0xff]   ;;  %v4349_v46 = vld [vmem:[#allocation8 + $0x1e4] ss:$16 sps:$4 sm:$0xff]  }
 0x193   :  { %1150 = vmatmul.mubr.bf16.vlgmr.msra.gmra.mrb[4].mxu0 %v284_v49  ;;  %1232 = vmatmul.mubr.bf16.vlgmr.msra.gmra.mrb[4].mxu1 %v284_v49  ;;  %v4350_v49 = vld [vmem:[#allocation8 + $0x1e8] ss:$16 sps:$4 sm:$0xff]  }
 0x194   :  { %2039 = vmatpush1.bf16.msra.mxu0 %v4257_v47  ;;  %2121 = vmatpush1.bf16.msra.mxu1 %v4260_v48  ;;  %v4352_v47 = vld [vmem:[#allocation8 + $0x1ec] ss:$16 sps:$4 sm:$0xff]   ;;  %v4347_v48 = vld [vmem:[#allocation8 + $0x1e0] ss:$16 sps:$4 sm:$0xff]  }
 0x195   :  { %2040 = vmatprep.subr.bf16.mxu0 %v4265_v29  ;;  %2122 = vmatprep.subr.bf16.mxu1 %v4268_v50  ;;  %v4355_v29 = vld [vmem:[#allocation8 + $0x204] ss:$16 sps:$4 sm:$0xff]   ;;  %v4358_v50 = vld [vmem:[#allocation8 + $0x20c] ss:$16 sps:$4 sm:$0xff]  }
 0x198   :  { %2041 = vmatpush1.bf16.msra.mxu0 %v4263_v51  ;;  %2123 = vmatpush1.bf16.msra.mxu1 %v4266_v52  ;;  %v5026_v51 = vld [vmem:[%s5081_s4] sm:$0xf] }
 0x199   :  { %2042 = vmatprep.subr.bf16.mxu0 %v4271_v53  ;;  %2124 = vmatprep.subr.bf16.mxu1 %v4274_v54  ;;  %v419_v52 = vrot.slane %v5026_v51, %v4996_v15  ;;  %v423_v53 = vrot.slane %v5026_v51, %v5004_v17  ;;  %v431_v54 = vrot.slane %v5026_v51, %v5009_v19 }
 0x19c   :  { %2043 = vmatpush1.bf16.msra.mxu0 %v4269_v55  ;;  %2125 = vmatpush1.bf16.msra.mxu1 %v4272_v56 }
 0x19d   :  { %2044 = vmatprep.subr.bf16.mxu0 %v4277_v57  ;;  %2126 = vmatprep.subr.bf16.mxu1 %v4280_v58 }
 0x1a0   :  { %2045 = vmatpush1.bf16.msra.mxu0 %v4275_v59  ;;  %2127 = vmatpush1.bf16.msra.mxu1 %v4278_v60 }
 0x1a1   :  { %2046 = vmatprep.subr.bf16.mxu0 %v4283_v61  ;;  %2128 = vmatprep.subr.bf16.mxu1 %v4286_v62 }
 0x1a4   :  { %2047 = vmatpush1.bf16.msra.mxu0 %v4281_v63  ;;  %2129 = vmatpush1.bf16.msra.mxu1 %v4284_v0 }
 0x1a5   :  { %2048 = vmatprep.subr.bf16.mxu0 %v4289_v1  ;;  %2130 = vmatprep.subr.bf16.mxu1 %v4292_v2 }
 0x1a8   :  { %2049 = vmatpush1.bf16.msra.mxu0 %v4287_v3  ;;  %2131 = vmatpush1.bf16.msra.mxu1 %v4290_v4 }
 0x1a9   :  { %2050 = vmatprep.subr.bf16.mxu0 %v4295_v5  ;;  %2132 = vmatprep.subr.bf16.mxu1 %v4298_v6  ;;  %v4353_v6 = vld [vmem:[#allocation8 + $0x200] ss:$16 sps:$4 sm:$0xff]  }
 0x1ac   :  { %2051 = vmatpush1.bf16.msra.mxu0 %v4293_v7  ;;  %2133 = vmatpush1.bf16.msra.mxu1 %v4296_v8  ;;  %v4356_v7 = vld [vmem:[#allocation8 + $0x208] ss:$16 sps:$4 sm:$0xff]  }
 0x1ad   :  { %2052 = vmatprep.subr.bf16.mxu0 %v4301_v9  ;;  %2134 = vmatprep.subr.bf16.mxu1 %v4304_v10  ;;  %v4361_v9 = vld [vmem:[#allocation8 + $0x224] ss:$16 sps:$4 sm:$0xff]   ;;  %v4364_v10 = vld [vmem:[#allocation8 + $0x22c] ss:$16 sps:$4 sm:$0xff]  }
 0x1b0   :  { %2053 = vmatpush1.bf16.msra.mxu0 %v4299_v11  ;;  %2135 = vmatpush1.bf16.msra.mxu1 %v4302_v12  ;;  %v4359_v12 = vld [vmem:[#allocation8 + $0x220] ss:$16 sps:$4 sm:$0xff]  }
 0x1b1   :  { %2054 = vmatprep.subr.bf16.mxu0 %v4307_v13  ;;  %2136 = vmatprep.subr.bf16.mxu1 %v4310_v18  ;;  %v4362_v13 = vld [vmem:[#allocation8 + $0x228] ss:$16 sps:$4 sm:$0xff]   ;;  %v4367_v18 = vld [vmem:[#allocation8 + $0x244] ss:$16 sps:$4 sm:$0xff]  }
 0x1b4   :  { %2055 = vmatpush1.bf16.msra.mxu0 %v4305_v20  ;;  %2137 = vmatpush1.bf16.msra.mxu1 %v4308_v21  ;;  %v4370_v20 = vld [vmem:[#allocation8 + $0x24c] ss:$16 sps:$4 sm:$0xff]   ;;  %v4365_v21 = vld [vmem:[#allocation8 + $0x240] ss:$16 sps:$4 sm:$0xff]  }
 0x1b5   :  { %2056 = vmatprep.subr.bf16.mxu0 %v4313_v22  ;;  %2138 = vmatprep.subr.bf16.mxu1 %v4316_v23  ;;  %v4368_v22 = vld [vmem:[#allocation8 + $0x248] ss:$16 sps:$4 sm:$0xff]   ;;  %v4373_v23 = vld [vmem:[#allocation8 + $0x264] ss:$16 sps:$4 sm:$0xff]  }
 0x1b8   :  { %2057 = vmatpush1.bf16.msra.mxu0 %v4311_v24  ;;  %2139 = vmatpush1.bf16.msra.mxu1 %v4314_v25  ;;  %v4376_v24 = vld [vmem:[#allocation8 + $0x26c] ss:$16 sps:$4 sm:$0xff]   ;;  %v4371_v25 = vld [vmem:[#allocation8 + $0x260] ss:$16 sps:$4 sm:$0xff]  }
 0x1b9   :  { %2058 = vmatprep.subr.bf16.mxu0 %v4319_v26  ;;  %2140 = vmatprep.subr.bf16.mxu1 %v4322_v27  ;;  %v4374_v26 = vld [vmem:[#allocation8 + $0x268] ss:$16 sps:$4 sm:$0xff]   ;;  %v4379_v27 = vld [vmem:[#allocation8 + $0x284] ss:$16 sps:$4 sm:$0xff]  }
 0x1bc   :  { %2059 = vmatpush1.bf16.msra.mxu0 %v4317_v28  ;;  %2141 = vmatpush1.bf16.msra.mxu1 %v4320_v30  ;;  %v4382_v28 = vld [vmem:[#allocation8 + $0x28c] ss:$16 sps:$4 sm:$0xff]   ;;  %v4377_v30 = vld [vmem:[#allocation8 + $0x280] ss:$16 sps:$4 sm:$0xff]  }
 0x1bd   :  { %2060 = vmatprep.subr.bf16.mxu0 %v4325_v32  ;;  %2142 = vmatprep.subr.bf16.mxu1 %v4328_v33  ;;  %v4380_v32 = vld [vmem:[#allocation8 + $0x288] ss:$16 sps:$4 sm:$0xff]   ;;  %v4385_v33 = vld [vmem:[#allocation8 + $0x2a4] ss:$16 sps:$4 sm:$0xff]  }
 0x1c0   :  { %2061 = vmatpush1.bf16.msra.mxu0 %v4323_v34  ;;  %2143 = vmatpush1.bf16.msra.mxu1 %v4326_v35  ;;  %v4388_v34 = vld [vmem:[#allocation8 + $0x2ac] ss:$16 sps:$4 sm:$0xff]   ;;  %v4383_v35 = vld [vmem:[#allocation8 + $0x2a0] ss:$16 sps:$4 sm:$0xff]  }
 0x1c1   :  { %2062 = vmatprep.subr.bf16.mxu0 %v4331_v36  ;;  %2144 = vmatprep.subr.bf16.mxu1 %v4334_v37  ;;  %v4386_v36 = vld [vmem:[#allocation8 + $0x2a8] ss:$16 sps:$4 sm:$0xff]   ;;  %v4391_v37 = vld [vmem:[#allocation8 + $0x2c4] ss:$16 sps:$4 sm:$0xff]  }
 0x1c4   :  { %2063 = vmatpush1.bf16.msra.mxu0 %v4329_v38  ;;  %2145 = vmatpush1.bf16.msra.mxu1 %v4332_v39  ;;  %v4394_v38 = vld [vmem:[#allocation8 + $0x2cc] ss:$16 sps:$4 sm:$0xff]   ;;  %v4389_v39 = vld [vmem:[#allocation8 + $0x2c0] ss:$16 sps:$4 sm:$0xff]  }
 0x1c5   :  { %2064 = vmatprep.subr.bf16.mxu0 %v4337_v40  ;;  %2146 = vmatprep.subr.bf16.mxu1 %v4340_v14  ;;  %v4392_v40 = vld [vmem:[#allocation8 + $0x2c8] ss:$16 sps:$4 sm:$0xff]   ;;  %v4397_v14 = vld [vmem:[#allocation8 + $0x2e4] ss:$16 sps:$4 sm:$0xff]  }
 0x1c8   :  { %2065 = vmatpush1.bf16.msra.mxu0 %v4335_v41  ;;  %2147 = vmatpush1.bf16.msra.mxu1 %v4338_v42  ;;  %v4400_v41 = vld [vmem:[#allocation8 + $0x2ec] ss:$16 sps:$4 sm:$0xff]   ;;  %v4395_v42 = vld [vmem:[#allocation8 + $0x2e0] ss:$16 sps:$4 sm:$0xff]  }
 0x1c9   :  { %2066 = vmatprep.subr.bf16.mxu0 %v4343_v43  ;;  %2148 = vmatprep.subr.bf16.mxu1 %v4346_v44  ;;  %v4398_v43 = vld [vmem:[#allocation8 + $0x2e8] ss:$16 sps:$4 sm:$0xff]   ;;  %v4403_v44 = vld [vmem:[#allocation8 + $0x304] ss:$16 sps:$4 sm:$0xff]  }
 0x1cc   :  { %2067 = vmatpush1.bf16.msra.mxu0 %v4341_v45  ;;  %2149 = vmatpush1.bf16.msra.mxu1 %v4344_v16  ;;  %v4406_v45 = vld [vmem:[#allocation8 + $0x30c] ss:$16 sps:$4 sm:$0xff]   ;;  %v4401_v16 = vld [vmem:[#allocation8 + $0x300] ss:$16 sps:$4 sm:$0xff]  }
 0x1cd   :  { %2068 = vmatprep.subr.bf16.mxu0 %v4349_v46  ;;  %2150 = vmatprep.subr.bf16.mxu1 %v4352_v47  ;;  %v4404_v46 = vld [vmem:[#allocation8 + $0x308] ss:$16 sps:$4 sm:$0xff]   ;;  %v4409_v47 = vld [vmem:[#allocation8 + $0x324] ss:$16 sps:$4 sm:$0xff]  }
 0x1d0   :  { %2069 = vmatpush1.bf16.msra.mxu0 %v4347_v48  ;;  %2151 = vmatpush1.bf16.msra.mxu1 %v4350_v49  ;;  %v4412_v48 = vld [vmem:[#allocation8 + $0x32c] ss:$16 sps:$4 sm:$0xff]   ;;  %v4407_v49 = vld [vmem:[#allocation8 + $0x320] ss:$16 sps:$4 sm:$0xff]  }
 0x1d1   :  { %2079 = vmatprep.subr.bf16.mxu0 %v4355_v29  ;;  %2161 = vmatprep.subr.bf16.mxu1 %v4358_v50  ;;  %v4410_v29 = vld [vmem:[#allocation8 + $0x328] ss:$16 sps:$4 sm:$0xff]   ;;  %v4415_v50 = vld [vmem:[#allocation8 + $0x344] ss:$16 sps:$4 sm:$0xff]  }
 0x266   :  { %v1151_v55 = vpop.f32.mrb[4].mxu0  ;;  %v5034_v56 = vpop.f32.mrb[4].mxu1 }
 0x267   :  { %v4005_v57 = vadd.f32 %v1151_v55, %v419_v52  ;;  %v1153_v58 = vpop.f32.mrb[5].mxu0  ;;  %v1235_v59 = vpop.f32.mrb[5].mxu1  ;;  %v4418_v52 = vld [vmem:[#allocation8 + $0x34c] ss:$16 sps:$4 sm:$0xff]   ;;  %v4421_v55 = vld [vmem:[#allocation8 + $0x364] ss:$16 sps:$4 sm:$0xff]  }
 0x268   :  { %v4006_v60 = vadd.f32 %v1153_v58, %v423_v53  ;;  %v4008_v61 = vadd.f32 %v1235_v59, %v431_v54  ;;  %v1155_v62 = vpop.f32.mrb[6].mxu0  ;;  %v1237_v63 = vpop.f32.mrb[6].mxu1  ;;  %v4413_v53 = vld [vmem:[#allocation8 + $0x340] ss:$16 sps:$4 sm:$0xff]   ;;  %v4416_v54 = vld [vmem:[#allocation8 + $0x348] ss:$16 sps:$4 sm:$0xff]  }
 0x269   :  { %v1240_v0 = vmax.f32 %v4005_v57, 0.0  ;;  %v1156_v1 = vpop.f32.mrb[7].mxu0  ;;  %v1238_v2 = vpop.f32.mrb[7].mxu1  ;;  %v4424_v57 = vld [vmem:[#allocation8 + $0x36c] ss:$16 sps:$4 sm:$0xff]  }
 0x26a   :  { %v1241_v3 = vmax.f32 %v4006_v60, 0.0  ;;  %v1243_v4 = vmax.f32 %v4008_v61, 0.0  ;;  %v4419_v58 = vld [vmem:[#allocation8 + $0x360] ss:$16 sps:$4 sm:$0xff]   ;;  %v4422_v59 = vld [vmem:[#allocation8 + $0x368] ss:$16 sps:$4 sm:$0xff]  }
 0x26b   :  { %v1244_v8 = vpack.c.bf16 %v1240_v0, %v1240_v0  ;;  %v4427_v60 = vld [vmem:[#allocation8 + $0x384] ss:$16 sps:$4 sm:$0xff]   ;;  %v4430_v61 = vld [vmem:[#allocation8 + $0x38c] ss:$16 sps:$4 sm:$0xff]   ;;  %v4425_v62 = vld [vmem:[#allocation8 + $0x380] ss:$16 sps:$4 sm:$0xff]  }
 0x26c   :  { %v1245_v5 = vpack.c.bf16 %v1241_v3, %v1241_v3  ;;  %v1247_v11 = vpack.c.bf16 %v1243_v4, %v1243_v4  ;;  %v4428_v63 = vld [vmem:[#allocation8 + $0x388] ss:$16 sps:$4 sm:$0xff]   ;;  %v4433_v0 = vld [vmem:[#allocation8 + $0x3a4] ss:$16 sps:$4 sm:$0xff]   ;;  %v4436_v1 = vld [vmem:[#allocation8 + $0x3ac] ss:$16 sps:$4 sm:$0xff]   ;;  %v427_v4 = vrot.slane %v5026_v51, %v5018_v31 }
 0x26d   :  { %v4431_v2 = vld [vmem:[#allocation8 + $0x3a0] ss:$16 sps:$4 sm:$0xff]   ;;  %v4434_v3 = vld [vmem:[#allocation8 + $0x3a8] ss:$16 sps:$4 sm:$0xff]   ;;  %v4451_v51 = vld [vmem:[#allocation10 + $0x4] ss:$16 sps:$4 sm:$0xff]  }
 0x26e   :  { %2070 = vmatprep.mubr.bf16.mxu0 %v1245_v5  ;;  %2152 = vmatprep.mubr.bf16.mxu1 %v1245_v5  ;;  %v4439_v5 = vld [vmem:[#allocation8 + $0x3c4] ss:$16 sps:$4 sm:$0xff]  }
 0x26f   :  { %2071 = vmatmul.mubr.bf16.vlgmr.msra.gmra.mrb[8].mxu0 %v1244_v8  ;;  %2153 = vmatmul.mubr.bf16.vlgmr.msra.gmra.mrb[8].mxu1 %v1244_v8  ;;  %v4440_v8 = vld [vmem:[#allocation8 + $0x3c8] ss:$16 sps:$4 sm:$0xff]  }
 0x270   :  { %2080 = vmatpush1.bf16.msra.mxu0 %v4353_v6  ;;  %2162 = vmatpush1.bf16.msra.mxu1 %v4356_v7  ;;  %v4442_v6 = vld [vmem:[#allocation8 + $0x3cc] ss:$16 sps:$4 sm:$0xff]   ;;  %v4437_v7 = vld [vmem:[#allocation8 + $0x3c0] ss:$16 sps:$4 sm:$0xff]  }
 0x271   :  { %2111 = vmatprep.mubr.bf16.mxu0 %v1247_v11  ;;  %2193 = vmatprep.mubr.bf16.mxu1 %v1247_v11  ;;  %v4448_v11 = vld [vmem:[#allocation8 + $0x3ec] ss:$16 sps:$4 sm:$0xff]  }
 0x272   :  { %2081 = vmatprep.subr.bf16.mxu0 %v4361_v9  ;;  %2163 = vmatprep.subr.bf16.mxu1 %v4364_v10  ;;  %v4007_v9 = vadd.f32 %v5034_v56, %v427_v4  ;;  %v4445_v10 = vld [vmem:[#allocation8 + $0x3e4] ss:$16 sps:$4 sm:$0xff]  }
 0x273   :  { %v4457_v56 = vld [vmem:[#allocation10 + $0x24] ss:$16 sps:$4 sm:$0xff]  }
 0x274   :  { %2082 = vmatpush1.bf16.msra.mxu0 %v4359_v12  ;;  %2164 = vmatpush1.bf16.msra.mxu1 %v4362_v13  ;;  %v4443_v12 = vld [vmem:[#allocation8 + $0x3e0] ss:$16 sps:$4 sm:$0xff]   ;;  %v4446_v13 = vld [vmem:[#allocation8 + $0x3e8] ss:$16 sps:$4 sm:$0xff]   ;;  %v4523_v4 = vld [vmem:[#allocation10 + $0x184] ss:$16 sps:$4 sm:$0xff]  }
 0x275   :  { %2083 = vmatprep.subr.bf16.mxu0 %v4367_v18  ;;  %2165 = vmatprep.subr.bf16.mxu1 %v4370_v20  ;;  %v1242_v18 = vmax.f32 %v4007_v9, 0.0  ;;  %v4454_v20 = vld [vmem:[#allocation10 + $0xc] ss:$16 sps:$4 sm:$0xff]  }
 0x276   :  { %v4532_v9 = vld [vmem:[#allocation10 + $0x1ac] ss:$16 sps:$4 sm:$0xff]  }
 0x278   :  { %2084 = vmatpush1.bf16.msra.mxu0 %v4365_v21  ;;  %2166 = vmatpush1.bf16.msra.mxu1 %v4368_v22  ;;  %v4449_v21 = vld [vmem:[#allocation10] ss:$16 sps:$4 sm:$0xff]   ;;  %v4452_v22 = vld [vmem:[#allocation10 + $0x8] ss:$16 sps:$4 sm:$0xff]  }
 0x279   :  { %2085 = vmatprep.subr.bf16.mxu0 %v4373_v23  ;;  %2167 = vmatprep.subr.bf16.mxu1 %v4376_v24  ;;  %v1246_v23 = vpack.c.bf16 %v1242_v18, %v1242_v18  ;;  %v4460_v24 = vld [vmem:[#allocation10 + $0x2c] ss:$16 sps:$4 sm:$0xff]   ;;  %v4533_v18 = vld [vmem:[#allocation10 + $0x1c0] ss:$16 sps:$4 sm:$0xff]  }
 0x27c   :  { %2086 = vmatpush1.bf16.msra.mxu0 %v4371_v25  ;;  %2168 = vmatpush1.bf16.msra.mxu1 %v4374_v26  ;;  %v4455_v25 = vld [vmem:[#allocation10 + $0x20] ss:$16 sps:$4 sm:$0xff]   ;;  %v4458_v26 = vld [vmem:[#allocation10 + $0x28] ss:$16 sps:$4 sm:$0xff]  }
 0x27d   :  { %2087 = vmatprep.subr.bf16.mxu0 %v4379_v27  ;;  %2169 = vmatprep.subr.bf16.mxu1 %v4382_v28  ;;  %v4463_v27 = vld [vmem:[#allocation10 + $0x44] ss:$16 sps:$4 sm:$0xff]   ;;  %v4466_v28 = vld [vmem:[#allocation10 + $0x4c] ss:$16 sps:$4 sm:$0xff]  }
 0x280   :  { %2088 = vmatpush1.bf16.msra.mxu0 %v4377_v30  ;;  %2170 = vmatpush1.bf16.msra.mxu1 %v4380_v32  ;;  %v4461_v30 = vld [vmem:[#allocation10 + $0x40] ss:$16 sps:$4 sm:$0xff]   ;;  %v4464_v32 = vld [vmem:[#allocation10 + $0x48] ss:$16 sps:$4 sm:$0xff]  }
 0x281   :  { %2089 = vmatprep.subr.bf16.mxu0 %v4385_v33  ;;  %2171 = vmatprep.subr.bf16.mxu1 %v4388_v34  ;;  %v4469_v33 = vld [vmem:[#allocation10 + $0x64] ss:$16 sps:$4 sm:$0xff]   ;;  %v4472_v34 = vld [vmem:[#allocation10 + $0x6c] ss:$16 sps:$4 sm:$0xff]  }
 0x284   :  { %2090 = vmatpush1.bf16.msra.mxu0 %v4383_v35  ;;  %2172 = vmatpush1.bf16.msra.mxu1 %v4386_v36  ;;  %v4467_v35 = vld [vmem:[#allocation10 + $0x60] ss:$16 sps:$4 sm:$0xff]   ;;  %v4470_v36 = vld [vmem:[#allocation10 + $0x68] ss:$16 sps:$4 sm:$0xff]  }
 0x285   :  { %2091 = vmatprep.subr.bf16.mxu0 %v4391_v37  ;;  %2173 = vmatprep.subr.bf16.mxu1 %v4394_v38  ;;  %v4475_v37 = vld [vmem:[#allocation10 + $0x84] ss:$16 sps:$4 sm:$0xff]   ;;  %v4478_v38 = vld [vmem:[#allocation10 + $0x8c] ss:$16 sps:$4 sm:$0xff]  }
 0x288   :  { %2092 = vmatpush1.bf16.msra.mxu0 %v4389_v39  ;;  %2174 = vmatpush1.bf16.msra.mxu1 %v4392_v40  ;;  %v4473_v39 = vld [vmem:[#allocation10 + $0x80] ss:$16 sps:$4 sm:$0xff]   ;;  %v4476_v40 = vld [vmem:[#allocation10 + $0x88] ss:$16 sps:$4 sm:$0xff]  }
 0x289   :  { %2093 = vmatprep.subr.bf16.mxu0 %v4397_v14  ;;  %2175 = vmatprep.subr.bf16.mxu1 %v4400_v41  ;;  %v4481_v14 = vld [vmem:[#allocation10 + $0xa4] ss:$16 sps:$4 sm:$0xff]   ;;  %v4484_v41 = vld [vmem:[#allocation10 + $0xac] ss:$16 sps:$4 sm:$0xff]  }
 0x28c   :  { %2094 = vmatpush1.bf16.msra.mxu0 %v4395_v42  ;;  %2176 = vmatpush1.bf16.msra.mxu1 %v4398_v43  ;;  %v4479_v42 = vld [vmem:[#allocation10 + $0xa0] ss:$16 sps:$4 sm:$0xff]   ;;  %v4482_v43 = vld [vmem:[#allocation10 + $0xa8] ss:$16 sps:$4 sm:$0xff]  }
 0x28d   :  { %2095 = vmatprep.subr.bf16.mxu0 %v4403_v44  ;;  %2177 = vmatprep.subr.bf16.mxu1 %v4406_v45  ;;  %v4487_v44 = vld [vmem:[#allocation10 + $0xc4] ss:$16 sps:$4 sm:$0xff]   ;;  %v4490_v45 = vld [vmem:[#allocation10 + $0xcc] ss:$16 sps:$4 sm:$0xff]  }
 0x290   :  { %2096 = vmatpush1.bf16.msra.mxu0 %v4401_v16  ;;  %2178 = vmatpush1.bf16.msra.mxu1 %v4404_v46  ;;  %v4485_v16 = vld [vmem:[#allocation10 + $0xc0] ss:$16 sps:$4 sm:$0xff]   ;;  %v4488_v46 = vld [vmem:[#allocation10 + $0xc8] ss:$16 sps:$4 sm:$0xff]  }
 0x291   :  { %2097 = vmatprep.subr.bf16.mxu0 %v4409_v47  ;;  %2179 = vmatprep.subr.bf16.mxu1 %v4412_v48  ;;  %v4493_v47 = vld [vmem:[#allocation10 + $0xe4] ss:$16 sps:$4 sm:$0xff]   ;;  %v4496_v48 = vld [vmem:[#allocation10 + $0xec] ss:$16 sps:$4 sm:$0xff]  }
 0x294   :  { %2098 = vmatpush1.bf16.msra.mxu0 %v4407_v49  ;;  %2180 = vmatpush1.bf16.msra.mxu1 %v4410_v29  ;;  %v4491_v49 = vld [vmem:[#allocation10 + $0xe0] ss:$16 sps:$4 sm:$0xff]   ;;  %v4494_v29 = vld [vmem:[#allocation10 + $0xe8] ss:$16 sps:$4 sm:$0xff]  }
 0x295   :  { %2099 = vmatprep.subr.bf16.mxu0 %v4415_v50  ;;  %2181 = vmatprep.subr.bf16.mxu1 %v4418_v52  ;;  %v4499_v50 = vld [vmem:[#allocation10 + $0x104] ss:$16 sps:$4 sm:$0xff]   ;;  %v4502_v52 = vld [vmem:[#allocation10 + $0x10c] ss:$16 sps:$4 sm:$0xff]  }
 0x298   :  { %2100 = vmatpush1.bf16.msra.mxu0 %v4413_v53  ;;  %2182 = vmatpush1.bf16.msra.mxu1 %v4416_v54  ;;  %v4497_v53 = vld [vmem:[#allocation10 + $0x100] ss:$16 sps:$4 sm:$0xff]   ;;  %v4500_v54 = vld [vmem:[#allocation10 + $0x108] ss:$16 sps:$4 sm:$0xff]  }
 0x299   :  { %2101 = vmatprep.subr.bf16.mxu0 %v4421_v55  ;;  %2183 = vmatprep.subr.bf16.mxu1 %v4424_v57  ;;  %v4505_v55 = vld [vmem:[#allocation10 + $0x124] ss:$16 sps:$4 sm:$0xff]   ;;  %v4508_v57 = vld [vmem:[#allocation10 + $0x12c] ss:$16 sps:$4 sm:$0xff]  }
 0x29c   :  { %2102 = vmatpush1.bf16.msra.mxu0 %v4419_v58  ;;  %2184 = vmatpush1.bf16.msra.mxu1 %v4422_v59  ;;  %v4503_v58 = vld [vmem:[#allocation10 + $0x120] ss:$16 sps:$4 sm:$0xff]   ;;  %v4506_v59 = vld [vmem:[#allocation10 + $0x128] ss:$16 sps:$4 sm:$0xff]  }
 0x29d   :  { %2103 = vmatprep.subr.bf16.mxu0 %v4427_v60  ;;  %2185 = vmatprep.subr.bf16.mxu1 %v4430_v61  ;;  %v4511_v60 = vld [vmem:[#allocation10 + $0x144] ss:$16 sps:$4 sm:$0xff]   ;;  %v4514_v61 = vld [vmem:[#allocation10 + $0x14c] ss:$16 sps:$4 sm:$0xff]  }
 0x2a0   :  { %2104 = vmatpush1.bf16.msra.mxu0 %v4425_v62  ;;  %2186 = vmatpush1.bf16.msra.mxu1 %v4428_v63  ;;  %v4509_v62 = vld [vmem:[#allocation10 + $0x140] ss:$16 sps:$4 sm:$0xff]   ;;  %v4512_v63 = vld [vmem:[#allocation10 + $0x148] ss:$16 sps:$4 sm:$0xff]  }
 0x2a1   :  { %2105 = vmatprep.subr.bf16.mxu0 %v4433_v0  ;;  %2187 = vmatprep.subr.bf16.mxu1 %v4436_v1  ;;  %v4517_v0 = vld [vmem:[#allocation10 + $0x164] ss:$16 sps:$4 sm:$0xff]   ;;  %v4520_v1 = vld [vmem:[#allocation10 + $0x16c] ss:$16 sps:$4 sm:$0xff]  }
 0x2a4   :  { %2106 = vmatpush1.bf16.msra.mxu0 %v4431_v2  ;;  %2188 = vmatpush1.bf16.msra.mxu1 %v4434_v3  ;;  %v4515_v2 = vld [vmem:[#allocation10 + $0x160] ss:$16 sps:$4 sm:$0xff]   ;;  %v4518_v3 = vld [vmem:[#allocation10 + $0x168] ss:$16 sps:$4 sm:$0xff]  }
 0x2a5   :  { %2107 = vmatprep.subr.bf16.mxu0 %v4439_v5  ;;  %2189 = vmatprep.subr.bf16.mxu1 %v4442_v6  ;;  %v4526_v5 = vld [vmem:[#allocation10 + $0x18c] ss:$16 sps:$4 sm:$0xff]   ;;  %v4521_v6 = vld [vmem:[#allocation10 + $0x180] ss:$16 sps:$4 sm:$0xff]  }
 0x2a8   :  { %2108 = vmatpush1.bf16.msra.mxu0 %v4437_v7  ;;  %2190 = vmatpush1.bf16.msra.mxu1 %v4440_v8  ;;  %v4524_v7 = vld [vmem:[#allocation10 + $0x188] ss:$16 sps:$4 sm:$0xff]   ;;  %v4529_v8 = vld [vmem:[#allocation10 + $0x1a4] ss:$16 sps:$4 sm:$0xff]  }
 0x2a9   :  { %2109 = vmatprep.subr.bf16.mxu0 %v4445_v10  ;;  %2191 = vmatprep.subr.bf16.mxu1 %v4448_v11  ;;  %v4527_v10 = vld [vmem:[#allocation10 + $0x1a0] ss:$16 sps:$4 sm:$0xff]   ;;  %v4530_v11 = vld [vmem:[#allocation10 + $0x1a8] ss:$16 sps:$4 sm:$0xff]  }
 0x2ac   :  { %2110 = vmatpush1.bf16.msra.mxu0 %v4443_v12  ;;  %2192 = vmatpush1.bf16.msra.mxu1 %v4446_v13  ;;  %v4535_v12 = vld [vmem:[#allocation10 + $0x1c4] ss:$16 sps:$4 sm:$0xff]   ;;  %v4538_v13 = vld [vmem:[#allocation10 + $0x1cc] ss:$16 sps:$4 sm:$0xff]  }
 0x2ad   :  { %3000 = vmatprep.subr.bf16.mxu0 %v4451_v51  ;;  %3082 = vmatprep.subr.bf16.mxu1 %v4454_v20  ;;  %v4536_v51 = vld [vmem:[#allocation10 + $0x1c8] ss:$16 sps:$4 sm:$0xff]   ;;  %v4541_v20 = vld [vmem:[#allocation10 + $0x1e4] ss:$16 sps:$4 sm:$0xff]  }
 0x2af   :  { %2112 = vmatmul.mubr.bf16.vlgmr.msra.gmra.mrb[8].mxu0 %v1246_v23  ;;  %2194 = vmatmul.mubr.bf16.vlgmr.msra.gmra.mrb[8].mxu1 %v1246_v23  ;;  %v4542_v23 = vld [vmem:[#allocation10 + $0x1e8] ss:$16 sps:$4 sm:$0xff]  }
 0x2b0   :  { %3001 = vmatpush1.bf16.msra.mxu0 %v4449_v21  ;;  %3083 = vmatpush1.bf16.msra.mxu1 %v4452_v22  ;;  %v4544_v21 = vld [vmem:[#allocation10 + $0x1ec] ss:$16 sps:$4 sm:$0xff]   ;;  %v4539_v22 = vld [vmem:[#allocation10 + $0x1e0] ss:$16 sps:$4 sm:$0xff]  }
 0x2b1   :  { %3002 = vmatprep.subr.bf16.mxu0 %v4457_v56  ;;  %3084 = vmatprep.subr.bf16.mxu1 %v4460_v24  ;;  %v4547_v56 = vld [vmem:[#allocation10 + $0x204] ss:$16 sps:$4 sm:$0xff]   ;;  %v4550_v24 = vld [vmem:[#allocation10 + $0x20c] ss:$16 sps:$4 sm:$0xff]  }
 0x2b4   :  { %3003 = vmatpush1.bf16.msra.mxu0 %v4455_v25  ;;  %3085 = vmatpush1.bf16.msra.mxu1 %v4458_v26  ;;  %v5042_v25 = vld [vmem:[%s5083_s6] sm:$0xf] }
 0x2b5   :  { %3004 = vmatprep.subr.bf16.mxu0 %v4463_v27  ;;  %3086 = vmatprep.subr.bf16.mxu1 %v4466_v28  ;;  %v1381_v26 = vrot.slane %v5042_v25, %v4996_v15  ;;  %v1385_v27 = vrot.slane %v5042_v25, %v5004_v17  ;;  %v1393_v28 = vrot.slane %v5042_v25, %v5009_v19 }
 0x2b8   :  { %3005 = vmatpush1.bf16.msra.mxu0 %v4461_v30  ;;  %3087 = vmatpush1.bf16.msra.mxu1 %v4464_v32 }
 0x2b9   :  { %3006 = vmatprep.subr.bf16.mxu0 %v4469_v33  ;;  %3088 = vmatprep.subr.bf16.mxu1 %v4472_v34 }
 0x2bc   :  { %3007 = vmatpush1.bf16.msra.mxu0 %v4467_v35  ;;  %3089 = vmatpush1.bf16.msra.mxu1 %v4470_v36 }
 0x2bd   :  { %3008 = vmatprep.subr.bf16.mxu0 %v4475_v37  ;;  %3090 = vmatprep.subr.bf16.mxu1 %v4478_v38 }
 0x2c0   :  { %3009 = vmatpush1.bf16.msra.mxu0 %v4473_v39  ;;  %3091 = vmatpush1.bf16.msra.mxu1 %v4476_v40 }
 0x2c1   :  { %3010 = vmatprep.subr.bf16.mxu0 %v4481_v14  ;;  %3092 = vmatprep.subr.bf16.mxu1 %v4484_v41 }
 0x2c4   :  { %3011 = vmatpush1.bf16.msra.mxu0 %v4479_v42  ;;  %3093 = vmatpush1.bf16.msra.mxu1 %v4482_v43 }
 0x2c5   :  { %3012 = vmatprep.subr.bf16.mxu0 %v4487_v44  ;;  %3094 = vmatprep.subr.bf16.mxu1 %v4490_v45  ;;  %v4545_v45 = vld [vmem:[#allocation10 + $0x200] ss:$16 sps:$4 sm:$0xff]  }
 0x2c8   :  { %3013 = vmatpush1.bf16.msra.mxu0 %v4485_v16  ;;  %3095 = vmatpush1.bf16.msra.mxu1 %v4488_v46  ;;  %v4548_v16 = vld [vmem:[#allocation10 + $0x208] ss:$16 sps:$4 sm:$0xff]  }
 0x2c9   :  { %3014 = vmatprep.subr.bf16.mxu0 %v4493_v47  ;;  %3096 = vmatprep.subr.bf16.mxu1 %v4496_v48  ;;  %v4553_v47 = vld [vmem:[#allocation10 + $0x224] ss:$16 sps:$4 sm:$0xff]   ;;  %v4556_v48 = vld [vmem:[#allocation10 + $0x22c] ss:$16 sps:$4 sm:$0xff]  }
 0x2cc   :  { %3015 = vmatpush1.bf16.msra.mxu0 %v4491_v49  ;;  %3097 = vmatpush1.bf16.msra.mxu1 %v4494_v29  ;;  %v4551_v29 = vld [vmem:[#allocation10 + $0x220] ss:$16 sps:$4 sm:$0xff]  }
 0x2cd   :  { %3016 = vmatprep.subr.bf16.mxu0 %v4499_v50  ;;  %3098 = vmatprep.subr.bf16.mxu1 %v4502_v52  ;;  %v4554_v50 = vld [vmem:[#allocation10 + $0x228] ss:$16 sps:$4 sm:$0xff]   ;;  %v4559_v52 = vld [vmem:[#allocation10 + $0x244] ss:$16 sps:$4 sm:$0xff]  }
 0x2d0   :  { %3017 = vmatpush1.bf16.msra.mxu0 %v4497_v53  ;;  %3099 = vmatpush1.bf16.msra.mxu1 %v4500_v54  ;;  %v4562_v53 = vld [vmem:[#allocation10 + $0x24c] ss:$16 sps:$4 sm:$0xff]   ;;  %v4557_v54 = vld [vmem:[#allocation10 + $0x240] ss:$16 sps:$4 sm:$0xff]  }
 0x2d1   :  { %3018 = vmatprep.subr.bf16.mxu0 %v4505_v55  ;;  %3100 = vmatprep.subr.bf16.mxu1 %v4508_v57  ;;  %v4560_v55 = vld [vmem:[#allocation10 + $0x248] ss:$16 sps:$4 sm:$0xff]   ;;  %v4565_v57 = vld [vmem:[#allocation10 + $0x264] ss:$16 sps:$4 sm:$0xff]  }
 0x2d4   :  { %3019 = vmatpush1.bf16.msra.mxu0 %v4503_v58  ;;  %3101 = vmatpush1.bf16.msra.mxu1 %v4506_v59  ;;  %v4568_v58 = vld [vmem:[#allocation10 + $0x26c] ss:$16 sps:$4 sm:$0xff]   ;;  %v4563_v59 = vld [vmem:[#allocation10 + $0x260] ss:$16 sps:$4 sm:$0xff]  }
 0x2d5   :  { %3020 = vmatprep.subr.bf16.mxu0 %v4511_v60  ;;  %3102 = vmatprep.subr.bf16.mxu1 %v4514_v61  ;;  %v4566_v60 = vld [vmem:[#allocation10 + $0x268] ss:$16 sps:$4 sm:$0xff]   ;;  %v4571_v61 = vld [vmem:[#allocation10 + $0x284] ss:$16 sps:$4 sm:$0xff]  }
 0x2d8   :  { %3021 = vmatpush1.bf16.msra.mxu0 %v4509_v62  ;;  %3103 = vmatpush1.bf16.msra.mxu1 %v4512_v63  ;;  %v4574_v62 = vld [vmem:[#allocation10 + $0x28c] ss:$16 sps:$4 sm:$0xff]   ;;  %v4569_v63 = vld [vmem:[#allocation10 + $0x280] ss:$16 sps:$4 sm:$0xff]  }
 0x2d9   :  { %3022 = vmatprep.subr.bf16.mxu0 %v4517_v0  ;;  %3104 = vmatprep.subr.bf16.mxu1 %v4520_v1  ;;  %v4572_v0 = vld [vmem:[#allocation10 + $0x288] ss:$16 sps:$4 sm:$0xff]   ;;  %v4577_v1 = vld [vmem:[#allocation10 + $0x2a4] ss:$16 sps:$4 sm:$0xff]  }
 0x2dc   :  { %3023 = vmatpush1.bf16.msra.mxu0 %v4515_v2  ;;  %3105 = vmatpush1.bf16.msra.mxu1 %v4518_v3  ;;  %v4580_v2 = vld [vmem:[#allocation10 + $0x2ac] ss:$16 sps:$4 sm:$0xff]   ;;  %v4575_v3 = vld [vmem:[#allocation10 + $0x2a0] ss:$16 sps:$4 sm:$0xff]  }
 0x2dd   :  { %3024 = vmatprep.subr.bf16.mxu0 %v4523_v4  ;;  %3106 = vmatprep.subr.bf16.mxu1 %v4526_v5  ;;  %v4578_v4 = vld [vmem:[#allocation10 + $0x2a8] ss:$16 sps:$4 sm:$0xff]   ;;  %v4583_v5 = vld [vmem:[#allocation10 + $0x2c4] ss:$16 sps:$4 sm:$0xff]  }
 0x2e0   :  { %3025 = vmatpush1.bf16.msra.mxu0 %v4521_v6  ;;  %3107 = vmatpush1.bf16.msra.mxu1 %v4524_v7  ;;  %v4586_v6 = vld [vmem:[#allocation10 + $0x2cc] ss:$16 sps:$4 sm:$0xff]   ;;  %v4581_v7 = vld [vmem:[#allocation10 + $0x2c0] ss:$16 sps:$4 sm:$0xff]  }
 0x2e1   :  { %3026 = vmatprep.subr.bf16.mxu0 %v4529_v8  ;;  %3108 = vmatprep.subr.bf16.mxu1 %v4532_v9  ;;  %v4584_v8 = vld [vmem:[#allocation10 + $0x2c8] ss:$16 sps:$4 sm:$0xff]   ;;  %v4589_v9 = vld [vmem:[#allocation10 + $0x2e4] ss:$16 sps:$4 sm:$0xff]  }
 0x2e4   :  { %3027 = vmatpush1.bf16.msra.mxu0 %v4527_v10  ;;  %3109 = vmatpush1.bf16.msra.mxu1 %v4530_v11  ;;  %v4592_v10 = vld [vmem:[#allocation10 + $0x2ec] ss:$16 sps:$4 sm:$0xff]   ;;  %v4587_v11 = vld [vmem:[#allocation10 + $0x2e0] ss:$16 sps:$4 sm:$0xff]  }
 0x2e5   :  { %3028 = vmatprep.subr.bf16.mxu0 %v4535_v12  ;;  %3110 = vmatprep.subr.bf16.mxu1 %v4538_v13  ;;  %v4590_v12 = vld [vmem:[#allocation10 + $0x2e8] ss:$16 sps:$4 sm:$0xff]   ;;  %v4595_v13 = vld [vmem:[#allocation10 + $0x304] ss:$16 sps:$4 sm:$0xff]  }
 0x2e8   :  { %3029 = vmatpush1.bf16.msra.mxu0 %v4533_v18  ;;  %3111 = vmatpush1.bf16.msra.mxu1 %v4536_v51  ;;  %v4598_v18 = vld [vmem:[#allocation10 + $0x30c] ss:$16 sps:$4 sm:$0xff]   ;;  %v4593_v51 = vld [vmem:[#allocation10 + $0x300] ss:$16 sps:$4 sm:$0xff]  }
 0x2e9   :  { %3030 = vmatprep.subr.bf16.mxu0 %v4541_v20  ;;  %3112 = vmatprep.subr.bf16.mxu1 %v4544_v21  ;;  %v4596_v20 = vld [vmem:[#allocation10 + $0x308] ss:$16 sps:$4 sm:$0xff]   ;;  %v4601_v21 = vld [vmem:[#allocation10 + $0x324] ss:$16 sps:$4 sm:$0xff]  }
 0x2ec   :  { %3031 = vmatpush1.bf16.msra.mxu0 %v4539_v22  ;;  %3113 = vmatpush1.bf16.msra.mxu1 %v4542_v23  ;;  %v4604_v22 = vld [vmem:[#allocation10 + $0x32c] ss:$16 sps:$4 sm:$0xff]   ;;  %v4599_v23 = vld [vmem:[#allocation10 + $0x320] ss:$16 sps:$4 sm:$0xff]  }
 0x2ed   :  { %3041 = vmatprep.subr.bf16.mxu0 %v4547_v56  ;;  %3123 = vmatprep.subr.bf16.mxu1 %v4550_v24  ;;  %v4602_v56 = vld [vmem:[#allocation10 + $0x328] ss:$16 sps:$4 sm:$0xff]   ;;  %v4607_v24 = vld [vmem:[#allocation10 + $0x344] ss:$16 sps:$4 sm:$0xff]  }
 0x382   :  { %v2113_v30 = vpop.f32.mrb[8].mxu0  ;;  %v5050_v32 = vpop.f32.mrb[8].mxu1 }
 0x383   :  { %v4009_v33 = vadd.f32 %v2113_v30, %v1381_v26  ;;  %v2115_v34 = vpop.f32.mrb[9].mxu0  ;;  %v2197_v35 = vpop.f32.mrb[9].mxu1  ;;  %v4610_v26 = vld [vmem:[#allocation10 + $0x34c] ss:$16 sps:$4 sm:$0xff]   ;;  %v4613_v30 = vld [vmem:[#allocation10 + $0x364] ss:$16 sps:$4 sm:$0xff]  }
 0x384   :  { %v4010_v36 = vadd.f32 %v2115_v34, %v1385_v27  ;;  %v4012_v37 = vadd.f32 %v2197_v35, %v1393_v28  ;;  %v2117_v38 = vpop.f32.mrb[10].mxu0  ;;  %v2199_v39 = vpop.f32.mrb[10].mxu1  ;;  %v4605_v27 = vld [vmem:[#allocation10 + $0x340] ss:$16 sps:$4 sm:$0xff]   ;;  %v4608_v28 = vld [vmem:[#allocation10 + $0x348] ss:$16 sps:$4 sm:$0xff]  }
 0x385   :  { %v2202_v40 = vmax.f32 %v4009_v33, 0.0  ;;  %v2118_v14 = vpop.f32.mrb[11].mxu0  ;;  %v2200_v41 = vpop.f32.mrb[11].mxu1  ;;  %v4616_v33 = vld [vmem:[#allocation10 + $0x36c] ss:$16 sps:$4 sm:$0xff]  }
 0x386   :  { %v2203_v42 = vmax.f32 %v4010_v36, 0.0  ;;  %v2205_v43 = vmax.f32 %v4012_v37, 0.0  ;;  %v4611_v34 = vld [vmem:[#allocation10 + $0x360] ss:$16 sps:$4 sm:$0xff]   ;;  %v4614_v35 = vld [vmem:[#allocation10 + $0x368] ss:$16 sps:$4 sm:$0xff]  }
 0x387   :  { %v2206_v46 = vpack.c.bf16 %v2202_v40, %v2202_v40  ;;  %v4619_v36 = vld [vmem:[#allocation10 + $0x384] ss:$16 sps:$4 sm:$0xff]   ;;  %v4622_v37 = vld [vmem:[#allocation10 + $0x38c] ss:$16 sps:$4 sm:$0xff]   ;;  %v4617_v38 = vld [vmem:[#allocation10 + $0x380] ss:$16 sps:$4 sm:$0xff]  }
 0x388   :  { %v2207_v44 = vpack.c.bf16 %v2203_v42, %v2203_v42  ;;  %v2209_v49 = vpack.c.bf16 %v2205_v43, %v2205_v43  ;;  %v4620_v39 = vld [vmem:[#allocation10 + $0x388] ss:$16 sps:$4 sm:$0xff]   ;;  %v4625_v40 = vld [vmem:[#allocation10 + $0x3a4] ss:$16 sps:$4 sm:$0xff]   ;;  %v4628_v14 = vld [vmem:[#allocation10 + $0x3ac] ss:$16 sps:$4 sm:$0xff]   ;;  %v1389_v43 = vrot.slane %v5042_v25, %v5018_v31 }
 0x389   :  { %v4623_v41 = vld [vmem:[#allocation10 + $0x3a0] ss:$16 sps:$4 sm:$0xff]   ;;  %v4626_v42 = vld [vmem:[#allocation10 + $0x3a8] ss:$16 sps:$4 sm:$0xff]  }
 0x38a   :  { %3032 = vmatprep.mubr.bf16.mxu0 %v2207_v44  ;;  %3114 = vmatprep.mubr.bf16.mxu1 %v2207_v44  ;;  %v4631_v44 = vld [vmem:[#allocation10 + $0x3c4] ss:$16 sps:$4 sm:$0xff]  }
 0x38b   :  { %3033 = vmatmul.mubr.bf16.vlgmr.msra.gmra.mrb[12].mxu0 %v2206_v46  ;;  %3115 = vmatmul.mubr.bf16.vlgmr.msra.gmra.mrb[12].mxu1 %v2206_v46  ;;  %v4632_v46 = vld [vmem:[#allocation10 + $0x3c8] ss:$16 sps:$4 sm:$0xff]   ;;  %v4641_v25 = vld [vmem:[#allocation11 + $0x40] sm:$0xff]  }
 0x38c   :  { %3042 = vmatpush1.bf16.msra.mxu0 %v4545_v45  ;;  %3124 = vmatpush1.bf16.msra.mxu1 %v4548_v16  ;;  %v4634_v45 = vld [vmem:[#allocation10 + $0x3cc] ss:$16 sps:$4 sm:$0xff]   ;;  %v4629_v16 = vld [vmem:[#allocation10 + $0x3c0] ss:$16 sps:$4 sm:$0xff]  }
 0x38d   :  { %3073 = vmatprep.mubr.bf16.mxu0 %v2209_v49  ;;  %3155 = vmatprep.mubr.bf16.mxu1 %v2209_v49  ;;  %v4640_v49 = vld [vmem:[#allocation10 + $0x3ec] ss:$16 sps:$4 sm:$0xff]  }
 0x38e   :  { %3043 = vmatprep.subr.bf16.mxu0 %v4553_v47  ;;  %3125 = vmatprep.subr.bf16.mxu1 %v4556_v48  ;;  %v4011_v47 = vadd.f32 %v5050_v32, %v1389_v43  ;;  %v4637_v48 = vld [vmem:[#allocation10 + $0x3e4] ss:$16 sps:$4 sm:$0xff]   ;;  %v4645_v32 = vld [vmem:[#allocation11 + $0x48] sm:$0xff]  }
 0x390   :  { %3044 = vmatpush1.bf16.msra.mxu0 %v4551_v29  ;;  %3126 = vmatpush1.bf16.msra.mxu1 %v4554_v50  ;;  %v4635_v29 = vld [vmem:[#allocation10 + $0x3e0] ss:$16 sps:$4 sm:$0xff]   ;;  %v4638_v50 = vld [vmem:[#allocation10 + $0x3e8] ss:$16 sps:$4 sm:$0xff]  }
 0x391   :  { %3045 = vmatprep.subr.bf16.mxu0 %v4559_v52  ;;  %3127 = vmatprep.subr.bf16.mxu1 %v4562_v53  ;;  %v2204_v52 = vmax.f32 %v4011_v47, 0.0  ;;  %v4642_v53 = vld [vmem:[#allocation11 + $0xc0] sm:$0xff]  }
 0x394   :  { %3046 = vmatpush1.bf16.msra.mxu0 %v4557_v54  ;;  %3128 = vmatpush1.bf16.msra.mxu1 %v4560_v55  ;;  %v4643_v54 = vld [vmem:[#allocation11] sm:$0xff]  }
 0x395   :  { %3047 = vmatprep.subr.bf16.mxu0 %v4565_v57  ;;  %3129 = vmatprep.subr.bf16.mxu1 %v4568_v58  ;;  %v4644_v55 = vld [vmem:[#allocation11 + $0x80] sm:$0xff]   ;;  %v2208_v57 = vpack.c.bf16 %v2204_v52, %v2204_v52  ;;  %v4646_v58 = vld [vmem:[#allocation11 + $0xc8] sm:$0xff]  }
 0x398   :  { %3048 = vmatpush1.bf16.msra.mxu0 %v4563_v59  ;;  %3130 = vmatpush1.bf16.msra.mxu1 %v4566_v60  ;;  %v4647_v59 = vld [vmem:[#allocation11 + $0x8] sm:$0xff]  }
 0x399   :  { %3049 = vmatprep.subr.bf16.mxu0 %v4571_v61  ;;  %3131 = vmatprep.subr.bf16.mxu1 %v4574_v62  ;;  %v4648_v60 = vld [vmem:[#allocation11 + $0x88] sm:$0xff]   ;;  %v4649_v61 = vld [vmem:[#allocation11 + $0x50] sm:$0xff]  }
 0x39a   :  { %v4650_v62 = vld [vmem:[#allocation11 + $0xd0] sm:$0xff]  }
 0x39c   :  { %3050 = vmatpush1.bf16.msra.mxu0 %v4569_v63  ;;  %3132 = vmatpush1.bf16.msra.mxu1 %v4572_v0  ;;  %v4651_v63 = vld [vmem:[#allocation11 + $0x10] sm:$0xff]  }
 0x39d   :  { %3051 = vmatprep.subr.bf16.mxu0 %v4577_v1  ;;  %3133 = vmatprep.subr.bf16.mxu1 %v4580_v2  ;;  %v4652_v0 = vld [vmem:[#allocation11 + $0x90] sm:$0xff]   ;;  %v4653_v1 = vld [vmem:[#allocation11 + $0x58] sm:$0xff]  }
 0x39e   :  { %v4654_v2 = vld [vmem:[#allocation11 + $0xd8] sm:$0xff]  }
 0x3a0   :  { %3052 = vmatpush1.bf16.msra.mxu0 %v4575_v3  ;;  %3134 = vmatpush1.bf16.msra.mxu1 %v4578_v4  ;;  %v4655_v3 = vld [vmem:[#allocation11 + $0x18] sm:$0xff]  }
 0x3a1   :  { %3053 = vmatprep.subr.bf16.mxu0 %v4583_v5  ;;  %3135 = vmatprep.subr.bf16.mxu1 %v4586_v6  ;;  %v4656_v4 = vld [vmem:[#allocation11 + $0x98] sm:$0xff]   ;;  %v4657_v5 = vld [vmem:[#allocation11 + $0x60] sm:$0xff]  }
 0x3a2   :  { %v4658_v6 = vld [vmem:[#allocation11 + $0xe0] sm:$0xff]  }
 0x3a4   :  { %3054 = vmatpush1.bf16.msra.mxu0 %v4581_v7  ;;  %3136 = vmatpush1.bf16.msra.mxu1 %v4584_v8  ;;  %v4659_v7 = vld [vmem:[#allocation11 + $0x20] sm:$0xff]  }
 0x3a5   :  { %3055 = vmatprep.subr.bf16.mxu0 %v4589_v9  ;;  %3137 = vmatprep.subr.bf16.mxu1 %v4592_v10  ;;  %v4660_v8 = vld [vmem:[#allocation11 + $0xa0] sm:$0xff]   ;;  %v4661_v9 = vld [vmem:[#allocation11 + $0x68] sm:$0xff]  }
 0x3a6   :  { %v4662_v10 = vld [vmem:[#allocation11 + $0xe8] sm:$0xff]  }
 0x3a8   :  { %3056 = vmatpush1.bf16.msra.mxu0 %v4587_v11  ;;  %3138 = vmatpush1.bf16.msra.mxu1 %v4590_v12  ;;  %v4663_v11 = vld [vmem:[#allocation11 + $0x28] sm:$0xff]  }
 0x3a9   :  { %3057 = vmatprep.subr.bf16.mxu0 %v4595_v13  ;;  %3139 = vmatprep.subr.bf16.mxu1 %v4598_v18  ;;  %v4664_v12 = vld [vmem:[#allocation11 + $0xa8] sm:$0xff]   ;;  %v4665_v13 = vld [vmem:[#allocation11 + $0x70] sm:$0xff]  }
 0x3aa   :  { %v4666_v18 = vld [vmem:[#allocation11 + $0xf0] sm:$0xff]  }
 0x3ac   :  { %3058 = vmatpush1.bf16.msra.mxu0 %v4593_v51  ;;  %3140 = vmatpush1.bf16.msra.mxu1 %v4596_v20  ;;  %v4667_v51 = vld [vmem:[#allocation11 + $0x30] sm:$0xff]  }
 0x3ad   :  { %3059 = vmatprep.subr.bf16.mxu0 %v4601_v21  ;;  %3141 = vmatprep.subr.bf16.mxu1 %v4604_v22  ;;  %v4668_v20 = vld [vmem:[#allocation11 + $0xb0] sm:$0xff]   ;;  %v4669_v21 = vld [vmem:[#allocation11 + $0x78] sm:$0xff]  }
 0x3ae   :  { %v4670_v22 = vld [vmem:[#allocation11 + $0xf8] sm:$0xff]  }
 0x3b0   :  { %3060 = vmatpush1.bf16.msra.mxu0 %v4599_v23  ;;  %3142 = vmatpush1.bf16.msra.mxu1 %v4602_v56  ;;  %v4671_v23 = vld [vmem:[#allocation11 + $0x38] sm:$0xff]  }
 0x3b1   :  { %3061 = vmatprep.subr.bf16.mxu0 %v4607_v24  ;;  %3143 = vmatprep.subr.bf16.mxu1 %v4610_v26  ;;  %v4672_v56 = vld [vmem:[#allocation11 + $0xb8] sm:$0xff]  }
 0x3b2   :  { %v2338_v24 = vld [vmem:[%s5085_s8] sm:$0xf] }
 0x3b3   :  { %v2343_v26 = vrot.slane %v2338_v24, %v4996_v15 }
 0x3b4   :  { %3062 = vmatpush1.bf16.msra.mxu0 %v4605_v27  ;;  %3144 = vmatpush1.bf16.msra.mxu1 %v4608_v28  ;;  %v2351_v27 = vrot.slane %v2338_v24, %v5018_v31  ;;  %v2347_v28 = vrot.slane %v2338_v24, %v5004_v17 }
 0x3b5   :  { %3063 = vmatprep.subr.bf16.mxu0 %v4613_v30  ;;  %3145 = vmatprep.subr.bf16.mxu1 %v4616_v33  ;;  %v2355_v30 = vrot.slane %v2338_v24, %v5009_v19 }
 0x3b8   :  { %3064 = vmatpush1.bf16.msra.mxu0 %v4611_v34  ;;  %3146 = vmatpush1.bf16.msra.mxu1 %v4614_v35 }
 0x3b9   :  { %3065 = vmatprep.subr.bf16.mxu0 %v4619_v36  ;;  %3147 = vmatprep.subr.bf16.mxu1 %v4622_v37 }
 0x3bc   :  { %3066 = vmatpush1.bf16.msra.mxu0 %v4617_v38  ;;  %3148 = vmatpush1.bf16.msra.mxu1 %v4620_v39 }
 0x3bd   :  { %3067 = vmatprep.subr.bf16.mxu0 %v4625_v40  ;;  %3149 = vmatprep.subr.bf16.mxu1 %v4628_v14 }
 0x3c0   :  { %3068 = vmatpush1.bf16.msra.mxu0 %v4623_v41  ;;  %3150 = vmatpush1.bf16.msra.mxu1 %v4626_v42 }
 0x3c1   :  { %3069 = vmatprep.subr.bf16.mxu0 %v4631_v44  ;;  %3151 = vmatprep.subr.bf16.mxu1 %v4634_v45 }
 0x3c4   :  { %3070 = vmatpush1.bf16.msra.mxu0 %v4629_v16  ;;  %3152 = vmatpush1.bf16.msra.mxu1 %v4632_v46 }
 0x3c5   :  { %3071 = vmatprep.subr.bf16.mxu0 %v4637_v48  ;;  %3153 = vmatprep.subr.bf16.mxu1 %v4640_v49  ;;  %v3928_v49 = vld [vmem:[%s5087_s10] ss:$0 sm:$0xff] }
 0x3c8   :  { %3072 = vmatpush1.bf16.msra.mxu0 %v4635_v29  ;;  %3154 = vmatpush1.bf16.msra.mxu1 %v4638_v50 }
 0x3c9   :  { %3961 = vmatprep.subr.bf16.mxu0 %v4641_v25  ;;  %3983 = vmatprep.subr.bf16.mxu1 %v4642_v53 }
 0x3cb   :  { %3074 = vmatmul.mubr.bf16.vlgmr.msra.gmra.mrb[12].mxu0 %v2208_v57  ;;  %3156 = vmatmul.mubr.bf16.vlgmr.msra.gmra.mrb[12].mxu1 %v2208_v57 }
 0x3cc   :  { %3962 = vmatpush3.bf16.msra.mxu0 %v4643_v54  ;;  %3984 = vmatpush3.bf16.msra.mxu1 %v4644_v55 }
 0x3cd   :  { %3963 = vmatprep.subr.bf16.mxu0 %v4645_v32  ;;  %3985 = vmatprep.subr.bf16.mxu1 %v4646_v58 }
 0x3d0   :  { %3964 = vmatpush3.bf16.msra.mxu0 %v4647_v59  ;;  %3986 = vmatpush3.bf16.msra.mxu1 %v4648_v60 }
 0x3d1   :  { %3965 = vmatprep.subr.bf16.mxu0 %v4649_v61  ;;  %3987 = vmatprep.subr.bf16.mxu1 %v4650_v62 }
 0x3d4   :  { %3966 = vmatpush3.bf16.msra.mxu0 %v4651_v63  ;;  %3988 = vmatpush3.bf16.msra.mxu1 %v4652_v0 }
 0x3d5   :  { %3967 = vmatprep.subr.bf16.mxu0 %v4653_v1  ;;  %3989 = vmatprep.subr.bf16.mxu1 %v4654_v2 }
 0x3d8   :  { %3968 = vmatpush3.bf16.msra.mxu0 %v4655_v3  ;;  %3990 = vmatpush3.bf16.msra.mxu1 %v4656_v4 }
 0x3d9   :  { %3969 = vmatprep.subr.bf16.mxu0 %v4657_v5  ;;  %3991 = vmatprep.subr.bf16.mxu1 %v4658_v6 }
 0x3dc   :  { %3970 = vmatpush3.bf16.msra.mxu0 %v4659_v7  ;;  %3992 = vmatpush3.bf16.msra.mxu1 %v4660_v8 }
 0x3dd   :  { %3971 = vmatprep.subr.bf16.mxu0 %v4661_v9  ;;  %3993 = vmatprep.subr.bf16.mxu1 %v4662_v10 }
 0x3e0   :  { %3972 = vmatpush3.bf16.msra.mxu0 %v4663_v11  ;;  %3994 = vmatpush3.bf16.msra.mxu1 %v4664_v12 }
 0x3e1   :  { %3973 = vmatprep.subr.bf16.mxu0 %v4665_v13  ;;  %3995 = vmatprep.subr.bf16.mxu1 %v4666_v18 }
 0x3e4   :  { %3974 = vmatpush3.bf16.msra.mxu0 %v4667_v51  ;;  %3996 = vmatpush3.bf16.msra.mxu1 %v4668_v20 }
 0x3e5   :  { %3975 = vmatprep.subr.bf16.mxu0 %v4669_v21  ;;  %3997 = vmatprep.subr.bf16.mxu1 %v4670_v22 }
 0x3e8   :  { %3976 = vmatpush3.bf16.msra.mxu0 %v4671_v23  ;;  %3998 = vmatpush3.bf16.msra.mxu1 %v4672_v56 }
 0x49e   :  { %v3075_v33 = vpop.f32.mrb[12].mxu0  ;;  %v3157_v34 = vpop.f32.mrb[12].mxu1 }
 0x49f   :  { %v4013_v35 = vadd.f32 %v3075_v33, %v2343_v26  ;;  %v4015_v36 = vadd.f32 %v3157_v34, %v2351_v27  ;;  %v3077_v37 = vpop.f32.mrb[13].mxu0  ;;  %v3159_v38 = vpop.f32.mrb[13].mxu1 }
 0x4a0   :  { %v4014_v39 = vadd.f32 %v3077_v37, %v2347_v28  ;;  %v4016_v40 = vadd.f32 %v3159_v38, %v2355_v30  ;;  %v3079_v14 = vpop.f32.mrb[14].mxu0  ;;  %v3161_v41 = vpop.f32.mrb[14].mxu1 }
 0x4a1   :  { %v3164_v42 = vmax.f32 %v4013_v35, 0.0  ;;  %v3166_v43 = vmax.f32 %v4015_v36, 0.0  ;;  %v3080_v44 = vpop.f32.mrb[15].mxu0  ;;  %v3162_v15 = vpop.f32.mrb[15].mxu1 }
 0x4a2   :  { %v3165_v45 = vmax.f32 %v4014_v39, 0.0  ;;  %v3167_v31 = vmax.f32 %v4016_v40, 0.0 }
 0x4a3   :  { %v3168_v46 = vpack.c.bf16 %v3164_v42, %v3164_v42  ;;  %v3170_v19 = vpack.c.bf16 %v3166_v43, %v3166_v43 }
 0x4a4   :  { %v3169_v16 = vpack.c.bf16 %v3165_v45, %v3165_v45  ;;  %v3171_v17 = vpack.c.bf16 %v3167_v31, %v3167_v31 }
 0x4a6   :  { %3467 = vmatprep.mubr.bf16.mxu0 %v3169_v16  ;;  %3507 = vmatprep.mubr.bf16.mxu1 %v3171_v17 }
 0x4a7   :  { %3468 = vmatmul.mubr.bf16.vlgmr.msra.gmra.mrb[16].mxu0 %v3168_v46  ;;  %3508 = vmatmul.mubr.bf16.vlgmr.msra.gmra.mrb[16].mxu1 %v3170_v19 }
 0x57a   :  { %v3977_v47 = vpop.f32.mrb[16].mxu0  ;;  %v3999_v48 = vpop.f32.mrb[16].mxu1 }
 0x57b   :  { %v3978_v29 = vpop.f32.mrb[17].mxu0  ;;  %v4000_v50 = vpop.f32.mrb[17].mxu1 }
 0x57c   :  { %v3979_v52 = vadd.f32 %v3978_v29, %v3977_v47  ;;  %v4001_v25 = vadd.f32 %v4000_v50, %v3999_v48  ;;  %v3980_v53 = vpop.f32.mrb[18].mxu0  ;;  %v4002_v54 = vpop.f32.mrb[18].mxu1 }
 0x57d   :  { %v3981_v55 = vpop.f32.mrb[19].mxu0  ;;  %v4003_v57 = vpop.f32.mrb[19].mxu1 }
 0x57e   :  { %v3470_v32 = vadd.f32 %v3979_v52, %v3928_v49 }
 0x580   :  { %v3510_v58 = vadd.f32 %v4001_v25, %v3470_v32 }
 0x582   :  { %3515 = vst [vmem:[#allocation13] sm:$0xff] %v3510_v58 }
 0x583   :  { %4816 = shalt.err (!%p4813_p10)
}
 0x584   :  { %s4817_s20 = scalar_lea.hbm %s5088_s11, 128 }
 0x585   :  { %p4818_p11 = scmp.ne.s32.totalorder %s5088_s11, %s4817_s20  ;;  %p4821_p12 = scmp.lt.u32.totalorder %s4817_s20, %s5088_s11 }
 0x587   :  { %p4823_p13 = pnand %p4821_p12, %p4818_p11 }
 0x589   :  { %4826 = shalt.err (!%p4823_p13)
}
 0x58a   :  { %3525 = dma.vmem_to_hbm [thread:$0]  %s3523_s19, 128, %s5088_s11, [#allocation4]  }
 0x58b   :  { %4835 = dma.done.wait [#allocation4], 128  }
 0x58c   :  { %4836 = vsyncadd [#allocation4], 4294967168 }
 0x58d   :  { %3529 = vsyncpa [#allocation3], 1 }
 0x58e   :  { %3530 = vsyncpa [#allocation6], 1 }
 0x58f   :  { %3531 = vsyncpa [#allocation9], 1 }
 0x590   :  { %3532 = vsyncpa [#allocation12], 1 }
 0x591   :  { %3533 = vsyncpa [#allocation4], 1 }

</bundles_post_ra>
